<compile_context>
chip_gen: v7x
topology: tpu7x:2x2x1
jax: 0.10.0
libtpu: 0.0.40
codegen_flags: <defaults>
</compile_context>

<pallas_src>
import jax
import jax.numpy as jnp
from jax.experimental import pallas as pl
from jax.experimental.pallas import tpu as pltpu


# -----------------------------------------------------------------------------
# Fused kernel factory: Bahdanau attention + single-layer unidirectional GRU
# -----------------------------------------------------------------------------
def _make_kernel(S, Hp, mxu_dtype, approx_recip):
    H3p = 3 * Hp

    def kernel(enc_ref, h0_ref,                          # activations
               w_enc_ref, w_hid_ref, b_w_ref, wv_ref,    # attention params
               wi_ref, wh_ref, bi_ref, bh_ref,           # GRU params
               out_ref, hN_ref,                          # outputs
               gx_scr, hs_scr):                          # VMEM scratch
        BT = enc_ref.shape[0]

        enc = enc_ref[...]                               # (BT, S, Hp) mxu_dtype
        h0 = h0_ref[...]                                 # (BT, Hp)    f32

        # ---------------- attention ----------------
        # W(cat(enc, h)) == enc @ W_enc + h @ W_hid (+ bias); flat 2-D MXU
        # matmuls, bf16 operands, f32 accumulation.
        eproj = jnp.dot(enc.reshape(BT * S, Hp), w_enc_ref[...],
                        preferred_element_type=jnp.float32).reshape(BT, S, Hp)
        hproj = jnp.dot(h0.astype(mxu_dtype), w_hid_ref[...],
                        preferred_element_type=jnp.float32)
        x = jnp.tanh(eproj + hproj[:, None, :] + b_w_ref[...][None, :, :])

        # V-projection + sum over features collapsed to a matvec.
        scores = jnp.sum(x * wv_ref[...][None, :, :], axis=2, keepdims=True)

        m = jnp.max(scores, axis=1, keepdims=True)
        e = jnp.exp(scores - m)
        denom = jnp.sum(e, axis=1, keepdims=True)
        if approx_recip:
            attn = e * pl.reciprocal(denom, approx=True)   # EUP slot, VALU-free
        else:
            attn = e / denom
        # Elementwise in f32 (v5e-friendly); cast only the matmul operand.
        ctx = (enc.astype(jnp.float32) * attn).astype(mxu_dtype)   # (BT,S,Hp)

        # ---------------- GRU ----------------
        # Hoisted x-side gate matmul: one big (BT*S,Hp)@(Hp,3Hp) MXU matmul,
        # then a static re-layout to a TIME-MAJOR scratch so the serial loop
        # only does leading-axis reads.
        gx = jnp.dot(ctx.reshape(BT * S, Hp), wi_ref[...],
                     preferred_element_type=jnp.float32) + bi_ref[...]
        gx3 = gx.reshape(BT, S, H3p)
        for t in range(S):                    # static, off the serial critical path
            gx_scr[t] = gx3[:, t, :]

        wh = wh_ref[...]                      # (Hp, 3Hp) loop-invariant (resident)
        bh = bh_ref[...]                      # (1, 3Hp)

        def step(t, h):
            gxt = gx_scr[t]                   # (BT, 3Hp) leading-axis dyn index
            gh = jnp.dot(h.astype(mxu_dtype), wh,
                         preferred_element_type=jnp.float32) + bh
            # r and z share one (wider) sigmoid call.
            rz = jax.nn.sigmoid(gxt[:, :2 * Hp] + gh[:, :2 * Hp])
            r = rz[:, :Hp]
            z = rz[:, Hp:]
            n = jnp.tanh(gxt[:, 2 * Hp:] + r * gh[:, 2 * Hp:])
            h_new = (1.0 - z) * n + z * h
            hs_scr[t] = h_new                 # time-major, leading-axis store
            return h_new

        # Unrolled: S is a compile-time constant; gives the scheduler the whole
        # serial chain so step t+1's gx load hides under step t's gh matmul.
        hN = jax.lax.fori_loop(0, S, step, h0, unroll=True)
        hN_ref[...] = hN

        # Epilogue: batch-major, lane-dense writeback (no wrapper transpose).
        hs = hs_scr[...]
        for t in range(S):                    # static
            out_ref[:, pl.ds(t, 1), :] = hs[t][:, None, :]

    return kernel


# -----------------------------------------------------------------------------
# Wrapper: padding, parameter re-layout, batch-tiled pallas_call
# -----------------------------------------------------------------------------
def decoder_attn_forward(inputs, hidden_states, params, *,
                         mxu_dtype=jnp.bfloat16, approx_recip=True,
                         batch_tile=8):
    """inputs: (B,S,H), hidden_states: (L,B,H).  Returns (outputs, hidden_states)."""
    B, S, H = inputs.shape
    f32 = jnp.float32

    # ---- lane padding (H -> multiple of 128) and batch tiling ----
    Hp = ((H + 127) // 128) * 128
    H3p = 3 * Hp
    if B <= batch_tile:
        BT, B_pad = B, B                       # block == full dim (no 8-divisibility issue)
    else:
        BT = batch_tile                        # multiple of 8 (sublane-aligned)
        B_pad = ((B + BT - 1) // BT) * BT
    nb = B_pad // BT

    h_last = hidden_states[-1].astype(f32)                         # (B, H)

    enc = jnp.zeros((B_pad, S, Hp), f32).at[:B, :, :H].set(inputs.astype(f32))
    h0 = jnp.zeros((B_pad, Hp), f32).at[:B, :H].set(h_last)
    enc = enc.astype(mxu_dtype)               # halves HBM->VMEM DMA for the big input

    # ---- attention params (PyTorch Linear stores weight as (out, in)) ----
    W_w, b_w = params["attn_W_weight"], params["attn_W_bias"]      # (H,2H), (H,)
    W_v = params["attn_V_weight"]                                   # (H,H)
    w_enc = jnp.zeros((Hp, Hp), f32).at[:H, :H].set(W_w[:, :H].T)
    w_hid = jnp.zeros((Hp, Hp), f32).at[:H, :H].set(W_w[:, H:].T)
    b_w_p = jnp.zeros((1, Hp), f32).at[0, :H].set(b_w)
    wv_p = jnp.zeros((1, Hp), f32).at[0, :H].set(W_v.sum(axis=0))   # matvec collapse

    # ---- GRU params: gates r|z|n, each lane-padded to its own Hp block ----
    def gate_weight(w):                        # (3H, H) -> (Hp, 3Hp), per-gate .T
        out = jnp.zeros((Hp, H3p), f32)
        for g in range(3):
            out = out.at[:H, g * Hp:g * Hp + H].set(w[g * H:(g + 1) * H, :].T)
        return out

    def gate_bias(b):                          # (3H,) -> (1, 3Hp)
        out = jnp.zeros((1, H3p), f32)
        for g in range(3):
            out = out.at[0, g * Hp:g * Hp + H].set(b[g * H:(g + 1) * H])
        return out

    wi_p = gate_weight(params["gru_weight_ih"]).astype(mxu_dtype)
    wh_p = gate_weight(params["gru_weight_hh"]).astype(mxu_dtype)
    bi_p = gate_bias(params["gru_bias_ih"])
    bh_p = gate_bias(params["gru_bias_hh"])
    w_enc = w_enc.astype(mxu_dtype)
    w_hid = w_hid.astype(mxu_dtype)

    kernel = _make_kernel(S, Hp, mxu_dtype, approx_recip)

    # ---- VMEM budget for one batch tile (double-buffered I/O + scratch) ----
    itm = jnp.dtype(mxu_dtype).itemsize
    est = (2 * BT * S * Hp * itm               # enc tile, double-buffered
           + 2 * BT * S * Hp * 4               # out tile, double-buffered
           + 4 * BT * Hp * 4                   # h0 / hN tiles
           + 2 * (2 * Hp * Hp + 2 * Hp * H3p) * itm   # weight blocks
           + S * BT * (H3p + Hp) * 4)          # gx / hs scratch
    vmem_limit = int(min(max(4 * est, 8 << 20), 32 << 20))

    def full2d(shape):
        return pl.BlockSpec(shape, lambda b: (0, 0))

    out, hN = pl.pallas_call(
        kernel,
        grid=(nb,),
        out_shape=(jax.ShapeDtypeStruct((B_pad, S, Hp), f32),
                   jax.ShapeDtypeStruct((B_pad, Hp), f32)),
        in_specs=[
            pl.BlockSpec((BT, S, Hp), lambda b: (b, 0, 0)),   # enc  (batch-tiled)
            pl.BlockSpec((BT, Hp), lambda b: (b, 0)),         # h0   (batch-tiled)
            full2d((Hp, Hp)),                                 # w_enc
            full2d((Hp, Hp)),                                 # w_hid
            full2d((1, Hp)),                                  # b_w
            full2d((1, Hp)),                                  # wv
            full2d((Hp, H3p)),                                # wi
            full2d((Hp, H3p)),                                # wh
            full2d((1, H3p)),                                 # bi
            full2d((1, H3p)),                                 # bh
        ],
        out_specs=(pl.BlockSpec((BT, S, Hp), lambda b: (b, 0, 0)),
                   pl.BlockSpec((BT, Hp), lambda b: (b, 0))),
        scratch_shapes=[pltpu.VMEM((S, BT, H3p), f32),        # gx, time-major
                        pltpu.VMEM((S, BT, Hp), f32)],        # per-step hidden
        compiler_params=pltpu.CompilerParams(
            dimension_semantics=("parallel",),                # both v7x TCs
            vmem_limit_bytes=vmem_limit),
    )(enc, h0, w_enc, w_hid, b_w_p, wv_p, wi_p, wh_p, bi_p, bh_p)

    outputs = out[:B, :, :H]                                  # drop padding
    hidden = hN[:B, :H][None, :, :]
    return outputs, hidden


# -----------------------------------------------------------------------------
# Pure-JAX reference (faithful to the PyTorch module) for semantics checks
# -----------------------------------------------------------------------------
def reference_forward(inputs, hidden_states, params):
    B, S, H = inputs.shape
    h_last = hidden_states[-1]
    dec = jnp.repeat(h_last[:, None, :], S, axis=1)
    x = jnp.tanh(jnp.concatenate([inputs, dec], axis=2) @ params["attn_W_weight"].T
                 + params["attn_W_bias"])
    x = x @ params["attn_V_weight"].T + params["attn_V_bias"]
    scores = jnp.sum(x, axis=2, keepdims=True)
    attn = jax.nn.softmax(scores, axis=1)
    ctx = inputs * attn

    wi = params["gru_weight_ih"]; wh = params["gru_weight_hh"]
    bi = params["gru_bias_ih"];   bh = params["gru_bias_hh"]

    def cell(h, x_t):
        gx = x_t @ wi.T + bi
        gh = h @ wh.T + bh
        r = jax.nn.sigmoid(gx[:, :H] + gh[:, :H])
        z = jax.nn.sigmoid(gx[:, H:2 * H] + gh[:, H:2 * H])
        n = jnp.tanh(gx[:, 2 * H:] + r * gh[:, 2 * H:])
        h_new = (1.0 - z) * n + z * h
        return h_new, h_new

    hN, ys = jax.lax.scan(cell, h_last, jnp.transpose(ctx, (1, 0, 2)))
    return jnp.transpose(ys, (1, 0, 2)), hN[None, :, :]


# -----------------------------------------------------------------------------
if __name__ == "__main__":
    B, S, H, L = 2, 8, 32, 1   # batch, seq, hidden_size, num_layers

    key = jax.random.PRNGKey(0)
    keys = jax.random.split(key, 10)
    bound = 1.0 / jnp.sqrt(H)

    def u(k, shape):
        return jax.random.uniform(k, shape, jnp.float32, -bound, bound)

    params = {
        "attn_W_weight": u(keys[0], (H, 2 * H)),
        "attn_W_bias":   u(keys[1], (H,)),
        "attn_V_weight": u(keys[2], (H, H)),
        "attn_V_bias":   u(keys[3], (H,)),
        "gru_weight_ih": u(keys[4], (3 * H, H)),
        "gru_weight_hh": u(keys[5], (3 * H, H)),
        "gru_bias_ih":   u(keys[6], (3 * H,)),
        "gru_bias_hh":   u(keys[7], (3 * H,)),
    }

    inputs = jax.random.normal(keys[8], (B, S, H), jnp.float32)
    hidden_states = jax.random.normal(keys[9], (L, B, H), jnp.float32)

    ref_out, ref_h = reference_forward(inputs, hidden_states, params)

    # Strict-precision run: f32 MXU operands, exact softmax divide — verifies
    # the kernel's math (padding, gate re-layout, matvec collapse) is exact.
    out32, h32 = decoder_attn_forward(inputs, hidden_states, params,
                                      mxu_dtype=jnp.float32, approx_recip=False)
    out32 = jax.block_until_ready(out32)
    h32 = jax.block_until_ready(h32)
    assert out32.shape == (B, S, H) and h32.shape == (L, B, H)
    assert jnp.allclose(out32, ref_out, atol=5e-5, rtol=5e-5)
    assert jnp.allclose(h32, ref_h, atol=5e-5, rtol=5e-5)

    # Default fast path: bf16 MXU operands (f32 accumulation) + EUP reciprocal.
    # Tolerance accounts for bf16 operand rounding (~4e-3 relative per matmul)
    # propagated through the softmax and the 8-step recurrence.
    out_bf, h_bf = decoder_attn_forward(inputs, hidden_states, params)
    out_bf = jax.block_until_ready(out_bf)
    h_bf = jax.block_until_ready(h_bf)
    assert out_bf.shape == (B, S, H) and h_bf.shape == (L, B, H)
    assert jnp.allclose(out_bf, ref_out, atol=8e-2, rtol=8e-2)
    assert jnp.allclose(h_bf, ref_h, atol=8e-2, rtol=8e-2)

    print("KERNEL_OK")
</pallas_src>

<mosaic_0001>
module attributes {stable_mosaic.version = 11 : i64} {
  func.func @kernel(%arg0: i32, %arg1: memref<2x8x128xf32, #tpu.memory_space<vmem>>, %arg2: memref<2x128xf32, #tpu.memory_space<vmem>>, %arg3: memref<128x128xf32, #tpu.memory_space<vmem>>, %arg4: memref<128x128xf32, #tpu.memory_space<vmem>>, %arg5: memref<1x128xf32, #tpu.memory_space<vmem>>, %arg6: memref<1x128xf32, #tpu.memory_space<vmem>>, %arg7: memref<128x384xf32, #tpu.memory_space<vmem>>, %arg8: memref<128x384xf32, #tpu.memory_space<vmem>>, %arg9: memref<1x384xf32, #tpu.memory_space<vmem>>, %arg10: memref<1x384xf32, #tpu.memory_space<vmem>>, %arg11: memref<2x8x128xf32, #tpu.memory_space<vmem>>, %arg12: memref<2x128xf32, #tpu.memory_space<vmem>>, %arg13: memref<8x2x384xf32, #tpu.memory_space<vmem>>, %arg14: memref<8x2x128xf32, #tpu.memory_space<vmem>>) attributes {dimension_semantics = [#tpu.dimension_semantics<parallel>], iteration_bounds = array<i64: 1>, scalar_prefetch = 0 : i64, scratch_operands = 2 : i64, tpu.core_type = #tpu.core_type<tc>, window_params = [{transform_indices = @transform_0, window_bounds = array<i64: 2, 8, 128>}, {transform_indices = @transform_1, window_bounds = array<i64: 2, 128>}, {pipeline_mode = #tpu.pipeline_mode<synchronous>, transform_indices = @transform_2, window_bounds = array<i64: 128, 128>}, {pipeline_mode = #tpu.pipeline_mode<synchronous>, transform_indices = @transform_3, window_bounds = array<i64: 128, 128>}, {pipeline_mode = #tpu.pipeline_mode<synchronous>, transform_indices = @transform_4, window_bounds = array<i64: 1, 128>}, {pipeline_mode = #tpu.pipeline_mode<synchronous>, transform_indices = @transform_5, window_bounds = array<i64: 1, 128>}, {pipeline_mode = #tpu.pipeline_mode<synchronous>, transform_indices = @transform_6, window_bounds = array<i64: 128, 384>}, {pipeline_mode = #tpu.pipeline_mode<synchronous>, transform_indices = @transform_7, window_bounds = array<i64: 128, 384>}, {pipeline_mode = #tpu.pipeline_mode<synchronous>, transform_indices = @transform_8, window_bounds = array<i64: 1, 384>}, {pipeline_mode = #tpu.pipeline_mode<synchronous>, transform_indices = @transform_9, window_bounds = array<i64: 1, 384>}, {transform_indices = @transform_10, window_bounds = array<i64: 2, 8, 128>}, {transform_indices = @transform_11, window_bounds = array<i64: 2, 128>}]} {
    %c0 = arith.constant 0 : index
    %c0_0 = arith.constant 0 : index
    %c0_1 = arith.constant 0 : index
    %0 = vector.load %arg1[%c0, %c0_0, %c0_1] : memref<2x8x128xf32, #tpu.memory_space<vmem>>, vector<2x8x128xf32>
    %c0_2 = arith.constant 0 : index
    %c0_3 = arith.constant 0 : index
    %1 = vector.load %arg2[%c0_2, %c0_3] : memref<2x128xf32, #tpu.memory_space<vmem>>, vector<2x128xf32>
    %2 = vector.shape_cast %0 : vector<2x8x128xf32> to vector<16x128xf32>
    %c0_4 = arith.constant 0 : index
    %c0_5 = arith.constant 0 : index
    %3 = vector.load %arg3[%c0_4, %c0_5] : memref<128x128xf32, #tpu.memory_space<vmem>>, vector<128x128xf32>
    %cst = arith.constant dense<0.000000e+00> : vector<16x128xf32>
    %4 = tpu.matmul %2, %3, %cst {dimension_numbers = #tpu.dot_dimension_numbers<[1], [0], [0], [1], [0, 0, 1, 1], [], []>} : vector<16x128xf32>, vector<128x128xf32>, vector<16x128xf32> -> vector<16x128xf32>
    %5 = vector.shape_cast %4 : vector<16x128xf32> to vector<2x8x128xf32>
    %c0_6 = arith.constant 0 : index
    %c0_7 = arith.constant 0 : index
    %6 = vector.load %arg4[%c0_6, %c0_7] : memref<128x128xf32, #tpu.memory_space<vmem>>, vector<128x128xf32>
    %cst_8 = arith.constant dense<0.000000e+00> : vector<2x128xf32>
    %7 = tpu.matmul %1, %6, %cst_8 {dimension_numbers = #tpu.dot_dimension_numbers<[1], [0], [0], [1], [0, 0, 1, 1], [], []>} : vector<2x128xf32>, vector<128x128xf32>, vector<2x128xf32> -> vector<2x128xf32>
    %8 = vector.shape_cast %7 : vector<2x128xf32> to vector<2x1x128xf32>
    %9 = vector.broadcast %8 : vector<2x1x128xf32> to vector<2x8x128xf32>
    %10 = arith.addf %5, %9 : vector<2x8x128xf32>
    %c0_9 = arith.constant 0 : index
    %c0_10 = arith.constant 0 : index
    %11 = vector.load %arg5[%c0_9, %c0_10] : memref<1x128xf32, #tpu.memory_space<vmem>>, vector<1x128xf32>
    %12 = vector.shape_cast %11 : vector<1x128xf32> to vector<1x1x128xf32>
    %13 = vector.broadcast %12 : vector<1x1x128xf32> to vector<2x8x128xf32>
    %14 = arith.addf %10, %13 : vector<2x8x128xf32>
    %15 = math.tanh %14 : vector<2x8x128xf32>
    %c0_11 = arith.constant 0 : index
    %c0_12 = arith.constant 0 : index
    %16 = vector.load %arg6[%c0_11, %c0_12] : memref<1x128xf32, #tpu.memory_space<vmem>>, vector<1x128xf32>
    %17 = vector.shape_cast %16 : vector<1x128xf32> to vector<1x1x128xf32>
    %18 = vector.broadcast %17 : vector<1x1x128xf32> to vector<2x8x128xf32>
    %19 = arith.mulf %15, %18 : vector<2x8x128xf32>
    %cst_13 = arith.constant dense<0.000000e+00> : vector<2x8xf32>
    %20 = vector.multi_reduction <add>, %19, %cst_13 [2] : vector<2x8x128xf32> to vector<2x8xf32>
    %21 = vector.shape_cast %20 : vector<2x8xf32> to vector<2x8x1xf32>
    %cst_14 = arith.constant dense<0xFF800000> : vector<2x1xf32>
    %22 = vector.multi_reduction <maximumf>, %21, %cst_14 [1] : vector<2x8x1xf32> to vector<2x1xf32>
    %23 = vector.shape_cast %22 : vector<2x1xf32> to vector<2x1x1xf32>
    %24 = vector.broadcast %23 : vector<2x1x1xf32> to vector<2x8x1xf32>
    %25 = arith.subf %21, %24 : vector<2x8x1xf32>
    %26 = math.exp %25 : vector<2x8x1xf32>
    %cst_15 = arith.constant dense<0.000000e+00> : vector<2x1xf32>
    %27 = vector.multi_reduction <add>, %26, %cst_15 [1] : vector<2x8x1xf32> to vector<2x1xf32>
    %28 = vector.shape_cast %27 : vector<2x1xf32> to vector<2x1x1xf32>
    %29 = vector.broadcast %28 : vector<2x1x1xf32> to vector<2x8x1xf32>
    %30 = arith.divf %26, %29 : vector<2x8x1xf32>
    %31 = vector.broadcast %30 : vector<2x8x1xf32> to vector<2x8x128xf32>
    %32 = arith.mulf %0, %31 : vector<2x8x128xf32>
    %33 = vector.shape_cast %32 : vector<2x8x128xf32> to vector<16x128xf32>
    %c0_16 = arith.constant 0 : index
    %c0_17 = arith.constant 0 : index
    %34 = vector.load %arg7[%c0_16, %c0_17] : memref<128x384xf32, #tpu.memory_space<vmem>>, vector<128x384xf32>
    %cst_18 = arith.constant dense<0.000000e+00> : vector<16x384xf32>
    %35 = tpu.matmul %33, %34, %cst_18 {dimension_numbers = #tpu.dot_dimension_numbers<[1], [0], [0], [1], [0, 0, 1, 1], [], []>} : vector<16x128xf32>, vector<128x384xf32>, vector<16x384xf32> -> vector<16x384xf32>
    %c0_19 = arith.constant 0 : index
    %c0_20 = arith.constant 0 : index
    %36 = vector.load %arg9[%c0_19, %c0_20] : memref<1x384xf32, #tpu.memory_space<vmem>>, vector<1x384xf32>
    %37 = vector.broadcast %36 : vector<1x384xf32> to vector<16x384xf32>
    %38 = arith.addf %35, %37 : vector<16x384xf32>
    %39 = vector.shape_cast %38 : vector<16x384xf32> to vector<2x8x384xf32>
    %40 = vector.extract_strided_slice %39 {offsets = [0, 0, 0], sizes = [2, 1, 384], strides = [1, 1, 1]} : vector<2x8x384xf32> to vector<2x1x384xf32>
    %41 = vector.shape_cast %40 : vector<2x1x384xf32> to vector<2x384xf32>
    %c0_21 = arith.constant 0 : index
    %c0_22 = arith.constant 0 : index
    %c0_23 = arith.constant 0 : index
    %42 = vector.load %arg13[%c0_21, %c0_22, %c0_23] : memref<8x2x384xf32, #tpu.memory_space<vmem>>, vector<1x2x384xf32>
    %43 = vector.shape_cast %42 : vector<1x2x384xf32> to vector<2x384xf32>
    %44 = vector.shape_cast %41 : vector<2x384xf32> to vector<1x2x384xf32>
    tpu.vector_store %arg13[%c0_21, %c0_22, %c0_23], %44 {strides = array<i32>} : memref<8x2x384xf32, #tpu.memory_space<vmem>>, vector<1x2x384xf32>,
    %45 = vector.extract_strided_slice %39 {offsets = [0, 1, 0], sizes = [2, 1, 384], strides = [1, 1, 1]} : vector<2x8x384xf32> to vector<2x1x384xf32>
    %46 = vector.shape_cast %45 : vector<2x1x384xf32> to vector<2x384xf32>
    %c1 = arith.constant 1 : index
    %c0_24 = arith.constant 0 : index
    %c0_25 = arith.constant 0 : index
    %47 = vector.load %arg13[%c1, %c0_24, %c0_25] : memref<8x2x384xf32, #tpu.memory_space<vmem>>, vector<1x2x384xf32>
    %48 = vector.shape_cast %47 : vector<1x2x384xf32> to vector<2x384xf32>
    %49 = vector.shape_cast %46 : vector<2x384xf32> to vector<1x2x384xf32>
    tpu.vector_store %arg13[%c1, %c0_24, %c0_25], %49 {strides = array<i32>} : memref<8x2x384xf32, #tpu.memory_space<vmem>>, vector<1x2x384xf32>,
    %50 = vector.extract_strided_slice %39 {offsets = [0, 2, 0], sizes = [2, 1, 384], strides = [1, 1, 1]} : vector<2x8x384xf32> to vector<2x1x384xf32>
    %51 = vector.shape_cast %50 : vector<2x1x384xf32> to vector<2x384xf32>
    %c2 = arith.constant 2 : index
    %c0_26 = arith.constant 0 : index
    %c0_27 = arith.constant 0 : index
    %52 = vector.load %arg13[%c2, %c0_26, %c0_27] : memref<8x2x384xf32, #tpu.memory_space<vmem>>, vector<1x2x384xf32>
    %53 = vector.shape_cast %52 : vector<1x2x384xf32> to vector<2x384xf32>
    %54 = vector.shape_cast %51 : vector<2x384xf32> to vector<1x2x384xf32>
    tpu.vector_store %arg13[%c2, %c0_26, %c0_27], %54 {strides = array<i32>} : memref<8x2x384xf32, #tpu.memory_space<vmem>>, vector<1x2x384xf32>,
    %55 = vector.extract_strided_slice %39 {offsets = [0, 3, 0], sizes = [2, 1, 384], strides = [1, 1, 1]} : vector<2x8x384xf32> to vector<2x1x384xf32>
    %56 = vector.shape_cast %55 : vector<2x1x384xf32> to vector<2x384xf32>
    %c3 = arith.constant 3 : index
    %c0_28 = arith.constant 0 : index
    %c0_29 = arith.constant 0 : index
    %57 = vector.load %arg13[%c3, %c0_28, %c0_29] : memref<8x2x384xf32, #tpu.memory_space<vmem>>, vector<1x2x384xf32>
    %58 = vector.shape_cast %57 : vector<1x2x384xf32> to vector<2x384xf32>
    %59 = vector.shape_cast %56 : vector<2x384xf32> to vector<1x2x384xf32>
    tpu.vector_store %arg13[%c3, %c0_28, %c0_29], %59 {strides = array<i32>} : memref<8x2x384xf32, #tpu.memory_space<vmem>>, vector<1x2x384xf32>,
    %60 = vector.extract_strided_slice %39 {offsets = [0, 4, 0], sizes = [2, 1, 384], strides = [1, 1, 1]} : vector<2x8x384xf32> to vector<2x1x384xf32>
    %61 = vector.shape_cast %60 : vector<2x1x384xf32> to vector<2x384xf32>
    %c4 = arith.constant 4 : index
    %c0_30 = arith.constant 0 : index
    %c0_31 = arith.constant 0 : index
    %62 = vector.load %arg13[%c4, %c0_30, %c0_31] : memref<8x2x384xf32, #tpu.memory_space<vmem>>, vector<1x2x384xf32>
    %63 = vector.shape_cast %62 : vector<1x2x384xf32> to vector<2x384xf32>
    %64 = vector.shape_cast %61 : vector<2x384xf32> to vector<1x2x384xf32>
    tpu.vector_store %arg13[%c4, %c0_30, %c0_31], %64 {strides = array<i32>} : memref<8x2x384xf32, #tpu.memory_space<vmem>>, vector<1x2x384xf32>,
    %65 = vector.extract_strided_slice %39 {offsets = [0, 5, 0], sizes = [2, 1, 384], strides = [1, 1, 1]} : vector<2x8x384xf32> to vector<2x1x384xf32>
    %66 = vector.shape_cast %65 : vector<2x1x384xf32> to vector<2x384xf32>
    %c5 = arith.constant 5 : index
    %c0_32 = arith.constant 0 : index
    %c0_33 = arith.constant 0 : index
    %67 = vector.load %arg13[%c5, %c0_32, %c0_33] : memref<8x2x384xf32, #tpu.memory_space<vmem>>, vector<1x2x384xf32>
    %68 = vector.shape_cast %67 : vector<1x2x384xf32> to vector<2x384xf32>
    %69 = vector.shape_cast %66 : vector<2x384xf32> to vector<1x2x384xf32>
    tpu.vector_store %arg13[%c5, %c0_32, %c0_33], %69 {strides = array<i32>} : memref<8x2x384xf32, #tpu.memory_space<vmem>>, vector<1x2x384xf32>,
    %70 = vector.extract_strided_slice %39 {offsets = [0, 6, 0], sizes = [2, 1, 384], strides = [1, 1, 1]} : vector<2x8x384xf32> to vector<2x1x384xf32>
    %71 = vector.shape_cast %70 : vector<2x1x384xf32> to vector<2x384xf32>
    %c6 = arith.constant 6 : index
    %c0_34 = arith.constant 0 : index
    %c0_35 = arith.constant 0 : index
    %72 = vector.load %arg13[%c6, %c0_34, %c0_35] : memref<8x2x384xf32, #tpu.memory_space<vmem>>, vector<1x2x384xf32>
    %73 = vector.shape_cast %72 : vector<1x2x384xf32> to vector<2x384xf32>
    %74 = vector.shape_cast %71 : vector<2x384xf32> to vector<1x2x384xf32>
    tpu.vector_store %arg13[%c6, %c0_34, %c0_35], %74 {strides = array<i32>} : memref<8x2x384xf32, #tpu.memory_space<vmem>>, vector<1x2x384xf32>,
    %75 = vector.extract_strided_slice %39 {offsets = [0, 7, 0], sizes = [2, 1, 384], strides = [1, 1, 1]} : vector<2x8x384xf32> to vector<2x1x384xf32>
    %76 = vector.shape_cast %75 : vector<2x1x384xf32> to vector<2x384xf32>
    %c7 = arith.constant 7 : index
    %c0_36 = arith.constant 0 : index
    %c0_37 = arith.constant 0 : index
    %77 = vector.load %arg13[%c7, %c0_36, %c0_37] : memref<8x2x384xf32, #tpu.memory_space<vmem>>, vector<1x2x384xf32>
    %78 = vector.shape_cast %77 : vector<1x2x384xf32> to vector<2x384xf32>
    %79 = vector.shape_cast %76 : vector<2x384xf32> to vector<1x2x384xf32>
    tpu.vector_store %arg13[%c7, %c0_36, %c0_37], %79 {strides = array<i32>} : memref<8x2x384xf32, #tpu.memory_space<vmem>>, vector<1x2x384xf32>,
    %c0_38 = arith.constant 0 : index
    %c0_39 = arith.constant 0 : index
    %80 = vector.load %arg8[%c0_38, %c0_39] : memref<128x384xf32, #tpu.memory_space<vmem>>, vector<128x384xf32>
    %c0_40 = arith.constant 0 : index
    %c0_41 = arith.constant 0 : index
    %81 = vector.load %arg10[%c0_40, %c0_41] : memref<1x384xf32, #tpu.memory_space<vmem>>, vector<1x384xf32>
    %c0_i32 = arith.constant 0 : i32
    %82 = arith.index_cast %c0_i32 : i32 to index
    %c0_42 = arith.constant 0 : index
    %c0_43 = arith.constant 0 : index
    %83 = vector.load %arg13[%82, %c0_42, %c0_43] : memref<8x2x384xf32, #tpu.memory_space<vmem>>, vector<1x2x384xf32>
    %84 = vector.shape_cast %83 : vector<1x2x384xf32> to vector<2x384xf32>
    %cst_44 = arith.constant dense<0.000000e+00> : vector<2x384xf32>
    %85 = tpu.matmul %1, %80, %cst_44 {dimension_numbers = #tpu.dot_dimension_numbers<[1], [0], [0], [1], [0, 0, 1, 1], [], []>} : vector<2x128xf32>, vector<128x384xf32>, vector<2x384xf32> -> vector<2x384xf32>
    %86 = vector.broadcast %81 : vector<1x384xf32> to vector<2x384xf32>
    %87 = arith.addf %85, %86 : vector<2x384xf32>
    %88 = vector.extract_strided_slice %84 {offsets = [0, 0], sizes = [2, 256], strides = [1, 1]} : vector<2x384xf32> to vector<2x256xf32>
    %89 = vector.extract_strided_slice %87 {offsets = [0, 0], sizes = [2, 256], strides = [1, 1]} : vector<2x384xf32> to vector<2x256xf32>
    %90 = arith.addf %88, %89 : vector<2x256xf32>
    %91 = arith.negf %90 : vector<2x256xf32>
    %92 = math.exp %91 : vector<2x256xf32>
    %cst_45 = arith.constant 1.000000e+00 : f32
    %93 = vector.broadcast %cst_45 : f32 to vector<2x256xf32>
    %94 = arith.addf %93, %92 : vector<2x256xf32>
    %95 = arith.divf %93, %94 : vector<2x256xf32>
    %96 = vector.extract_strided_slice %95 {offsets = [0, 0], sizes = [2, 128], strides = [1, 1]} : vector<2x256xf32> to vector<2x128xf32>
    %97 = vector.extract_strided_slice %95 {offsets = [0, 128], sizes = [2, 128], strides = [1, 1]} : vector<2x256xf32> to vector<2x128xf32>
    %98 = vector.extract_strided_slice %84 {offsets = [0, 256], sizes = [2, 128], strides = [1, 1]} : vector<2x384xf32> to vector<2x128xf32>
    %99 = vector.extract_strided_slice %87 {offsets = [0, 256], sizes = [2, 128], strides = [1, 1]} : vector<2x384xf32> to vector<2x128xf32>
    %100 = arith.mulf %96, %99 : vector<2x128xf32>
    %101 = arith.addf %98, %100 : vector<2x128xf32>
    %102 = math.tanh %101 : vector<2x128xf32>
    %cst_46 = arith.constant 1.000000e+00 : f32
    %103 = vector.broadcast %cst_46 : f32 to vector<2x128xf32>
    %104 = arith.subf %103, %97 : vector<2x128xf32>
    %105 = arith.mulf %104, %102 : vector<2x128xf32>
    %106 = arith.mulf %97, %1 : vector<2x128xf32>
    %107 = arith.addf %105, %106 : vector<2x128xf32>
    %108 = arith.index_cast %c0_i32 : i32 to index
    %c0_47 = arith.constant 0 : index
    %c0_48 = arith.constant 0 : index
    %109 = vector.load %arg14[%108, %c0_47, %c0_48] : memref<8x2x128xf32, #tpu.memory_space<vmem>>, vector<1x2x128xf32>
    %110 = vector.shape_cast %109 : vector<1x2x128xf32> to vector<2x128xf32>
    %111 = vector.shape_cast %107 : vector<2x128xf32> to vector<1x2x128xf32>
    tpu.vector_store %arg14[%108, %c0_47, %c0_48], %111 {strides = array<i32>} : memref<8x2x128xf32, #tpu.memory_space<vmem>>, vector<1x2x128xf32>,
    %c1_i32 = arith.constant 1 : i32
    %112 = arith.index_cast %c1_i32 : i32 to index
    %c0_49 = arith.constant 0 : index
    %c0_50 = arith.constant 0 : index
    %113 = vector.load %arg13[%112, %c0_49, %c0_50] : memref<8x2x384xf32, #tpu.memory_space<vmem>>, vector<1x2x384xf32>
    %114 = vector.shape_cast %113 : vector<1x2x384xf32> to vector<2x384xf32>
    %cst_51 = arith.constant dense<0.000000e+00> : vector<2x384xf32>
    %115 = tpu.matmul %107, %80, %cst_51 {dimension_numbers = #tpu.dot_dimension_numbers<[1], [0], [0], [1], [0, 0, 1, 1], [], []>} : vector<2x128xf32>, vector<128x384xf32>, vector<2x384xf32> -> vector<2x384xf32>
    %116 = vector.broadcast %81 : vector<1x384xf32> to vector<2x384xf32>
    %117 = arith.addf %115, %116 : vector<2x384xf32>
    %118 = vector.extract_strided_slice %114 {offsets = [0, 0], sizes = [2, 256], strides = [1, 1]} : vector<2x384xf32> to vector<2x256xf32>
    %119 = vector.extract_strided_slice %117 {offsets = [0, 0], sizes = [2, 256], strides = [1, 1]} : vector<2x384xf32> to vector<2x256xf32>
    %120 = arith.addf %118, %119 : vector<2x256xf32>
    %121 = arith.negf %120 : vector<2x256xf32>
    %122 = math.exp %121 : vector<2x256xf32>
    %cst_52 = arith.constant 1.000000e+00 : f32
    %123 = vector.broadcast %cst_52 : f32 to vector<2x256xf32>
    %124 = arith.addf %123, %122 : vector<2x256xf32>
    %125 = arith.divf %123, %124 : vector<2x256xf32>
    %126 = vector.extract_strided_slice %125 {offsets = [0, 0], sizes = [2, 128], strides = [1, 1]} : vector<2x256xf32> to vector<2x128xf32>
    %127 = vector.extract_strided_slice %125 {offsets = [0, 128], sizes = [2, 128], strides = [1, 1]} : vector<2x256xf32> to vector<2x128xf32>
    %128 = vector.extract_strided_slice %114 {offsets = [0, 256], sizes = [2, 128], strides = [1, 1]} : vector<2x384xf32> to vector<2x128xf32>
    %129 = vector.extract_strided_slice %117 {offsets = [0, 256], sizes = [2, 128], strides = [1, 1]} : vector<2x384xf32> to vector<2x128xf32>
    %130 = arith.mulf %126, %129 : vector<2x128xf32>
    %131 = arith.addf %128, %130 : vector<2x128xf32>
    %132 = math.tanh %131 : vector<2x128xf32>
    %cst_53 = arith.constant 1.000000e+00 : f32
    %133 = vector.broadcast %cst_53 : f32 to vector<2x128xf32>
    %134 = arith.subf %133, %127 : vector<2x128xf32>
    %135 = arith.mulf %134, %132 : vector<2x128xf32>
    %136 = arith.mulf %127, %107 : vector<2x128xf32>
    %137 = arith.addf %135, %136 : vector<2x128xf32>
    %138 = arith.index_cast %c1_i32 : i32 to index
    %c0_54 = arith.constant 0 : index
    %c0_55 = arith.constant 0 : index
    %139 = vector.load %arg14[%138, %c0_54, %c0_55] : memref<8x2x128xf32, #tpu.memory_space<vmem>>, vector<1x2x128xf32>
    %140 = vector.shape_cast %139 : vector<1x2x128xf32> to vector<2x128xf32>
    %141 = vector.shape_cast %137 : vector<2x128xf32> to vector<1x2x128xf32>
    tpu.vector_store %arg14[%138, %c0_54, %c0_55], %141 {strides = array<i32>} : memref<8x2x128xf32, #tpu.memory_space<vmem>>, vector<1x2x128xf32>,
    %c2_i32 = arith.constant 2 : i32
    %142 = arith.index_cast %c2_i32 : i32 to index
    %c0_56 = arith.constant 0 : index
    %c0_57 = arith.constant 0 : index
    %143 = vector.load %arg13[%142, %c0_56, %c0_57] : memref<8x2x384xf32, #tpu.memory_space<vmem>>, vector<1x2x384xf32>
    %144 = vector.shape_cast %143 : vector<1x2x384xf32> to vector<2x384xf32>
    %cst_58 = arith.constant dense<0.000000e+00> : vector<2x384xf32>
    %145 = tpu.matmul %137, %80, %cst_58 {dimension_numbers = #tpu.dot_dimension_numbers<[1], [0], [0], [1], [0, 0, 1, 1], [], []>} : vector<2x128xf32>, vector<128x384xf32>, vector<2x384xf32> -> vector<2x384xf32>
    %146 = vector.broadcast %81 : vector<1x384xf32> to vector<2x384xf32>
    %147 = arith.addf %145, %146 : vector<2x384xf32>
    %148 = vector.extract_strided_slice %144 {offsets = [0, 0], sizes = [2, 256], strides = [1, 1]} : vector<2x384xf32> to vector<2x256xf32>
    %149 = vector.extract_strided_slice %147 {offsets = [0, 0], sizes = [2, 256], strides = [1, 1]} : vector<2x384xf32> to vector<2x256xf32>
    %150 = arith.addf %148, %149 : vector<2x256xf32>
    %151 = arith.negf %150 : vector<2x256xf32>
    %152 = math.exp %151 : vector<2x256xf32>
    %cst_59 = arith.constant 1.000000e+00 : f32
    %153 = vector.broadcast %cst_59 : f32 to vector<2x256xf32>
    %154 = arith.addf %153, %152 : vector<2x256xf32>
    %155 = arith.divf %153, %154 : vector<2x256xf32>
    %156 = vector.extract_strided_slice %155 {offsets = [0, 0], sizes = [2, 128], strides = [1, 1]} : vector<2x256xf32> to vector<2x128xf32>
    %157 = vector.extract_strided_slice %155 {offsets = [0, 128], sizes = [2, 128], strides = [1, 1]} : vector<2x256xf32> to vector<2x128xf32>
    %158 = vector.extract_strided_slice %144 {offsets = [0, 256], sizes = [2, 128], strides = [1, 1]} : vector<2x384xf32> to vector<2x128xf32>
    %159 = vector.extract_strided_slice %147 {offsets = [0, 256], sizes = [2, 128], strides = [1, 1]} : vector<2x384xf32> to vector<2x128xf32>
    %160 = arith.mulf %156, %159 : vector<2x128xf32>
    %161 = arith.addf %158, %160 : vector<2x128xf32>
    %162 = math.tanh %161 : vector<2x128xf32>
    %cst_60 = arith.constant 1.000000e+00 : f32
    %163 = vector.broadcast %cst_60 : f32 to vector<2x128xf32>
    %164 = arith.subf %163, %157 : vector<2x128xf32>
    %165 = arith.mulf %164, %162 : vector<2x128xf32>
    %166 = arith.mulf %157, %137 : vector<2x128xf32>
    %167 = arith.addf %165, %166 : vector<2x128xf32>
    %168 = arith.index_cast %c2_i32 : i32 to index
    %c0_61 = arith.constant 0 : index
    %c0_62 = arith.constant 0 : index
    %169 = vector.load %arg14[%168, %c0_61, %c0_62] : memref<8x2x128xf32, #tpu.memory_space<vmem>>, vector<1x2x128xf32>
    %170 = vector.shape_cast %169 : vector<1x2x128xf32> to vector<2x128xf32>
    %171 = vector.shape_cast %167 : vector<2x128xf32> to vector<1x2x128xf32>
    tpu.vector_store %arg14[%168, %c0_61, %c0_62], %171 {strides = array<i32>} : memref<8x2x128xf32, #tpu.memory_space<vmem>>, vector<1x2x128xf32>,
    %c3_i32 = arith.constant 3 : i32
    %172 = arith.index_cast %c3_i32 : i32 to index
    %c0_63 = arith.constant 0 : index
    %c0_64 = arith.constant 0 : index
    %173 = vector.load %arg13[%172, %c0_63, %c0_64] : memref<8x2x384xf32, #tpu.memory_space<vmem>>, vector<1x2x384xf32>
    %174 = vector.shape_cast %173 : vector<1x2x384xf32> to vector<2x384xf32>
    %cst_65 = arith.constant dense<0.000000e+00> : vector<2x384xf32>
    %175 = tpu.matmul %167, %80, %cst_65 {dimension_numbers = #tpu.dot_dimension_numbers<[1], [0], [0], [1], [0, 0, 1, 1], [], []>} : vector<2x128xf32>, vector<128x384xf32>, vector<2x384xf32> -> vector<2x384xf32>
    %176 = vector.broadcast %81 : vector<1x384xf32> to vector<2x384xf32>
    %177 = arith.addf %175, %176 : vector<2x384xf32>
    %178 = vector.extract_strided_slice %174 {offsets = [0, 0], sizes = [2, 256], strides = [1, 1]} : vector<2x384xf32> to vector<2x256xf32>
    %179 = vector.extract_strided_slice %177 {offsets = [0, 0], sizes = [2, 256], strides = [1, 1]} : vector<2x384xf32> to vector<2x256xf32>
    %180 = arith.addf %178, %179 : vector<2x256xf32>
    %181 = arith.negf %180 : vector<2x256xf32>
    %182 = math.exp %181 : vector<2x256xf32>
    %cst_66 = arith.constant 1.000000e+00 : f32
    %183 = vector.broadcast %cst_66 : f32 to vector<2x256xf32>
    %184 = arith.addf %183, %182 : vector<2x256xf32>
    %185 = arith.divf %183, %184 : vector<2x256xf32>
    %186 = vector.extract_strided_slice %185 {offsets = [0, 0], sizes = [2, 128], strides = [1, 1]} : vector<2x256xf32> to vector<2x128xf32>
    %187 = vector.extract_strided_slice %185 {offsets = [0, 128], sizes = [2, 128], strides = [1, 1]} : vector<2x256xf32> to vector<2x128xf32>
    %188 = vector.extract_strided_slice %174 {offsets = [0, 256], sizes = [2, 128], strides = [1, 1]} : vector<2x384xf32> to vector<2x128xf32>
    %189 = vector.extract_strided_slice %177 {offsets = [0, 256], sizes = [2, 128], strides = [1, 1]} : vector<2x384xf32> to vector<2x128xf32>
    %190 = arith.mulf %186, %189 : vector<2x128xf32>
    %191 = arith.addf %188, %190 : vector<2x128xf32>
    %192 = math.tanh %191 : vector<2x128xf32>
    %cst_67 = arith.constant 1.000000e+00 : f32
    %193 = vector.broadcast %cst_67 : f32 to vector<2x128xf32>
    %194 = arith.subf %193, %187 : vector<2x128xf32>
    %195 = arith.mulf %194, %192 : vector<2x128xf32>
    %196 = arith.mulf %187, %167 : vector<2x128xf32>
    %197 = arith.addf %195, %196 : vector<2x128xf32>
    %198 = arith.index_cast %c3_i32 : i32 to index
    %c0_68 = arith.constant 0 : index
    %c0_69 = arith.constant 0 : index
    %199 = vector.load %arg14[%198, %c0_68, %c0_69] : memref<8x2x128xf32, #tpu.memory_space<vmem>>, vector<1x2x128xf32>
    %200 = vector.shape_cast %199 : vector<1x2x128xf32> to vector<2x128xf32>
    %201 = vector.shape_cast %197 : vector<2x128xf32> to vector<1x2x128xf32>
    tpu.vector_store %arg14[%198, %c0_68, %c0_69], %201 {strides = array<i32>} : memref<8x2x128xf32, #tpu.memory_space<vmem>>, vector<1x2x128xf32>,
    %c4_i32 = arith.constant 4 : i32
    %202 = arith.index_cast %c4_i32 : i32 to index
    %c0_70 = arith.constant 0 : index
    %c0_71 = arith.constant 0 : index
    %203 = vector.load %arg13[%202, %c0_70, %c0_71] : memref<8x2x384xf32, #tpu.memory_space<vmem>>, vector<1x2x384xf32>
    %204 = vector.shape_cast %203 : vector<1x2x384xf32> to vector<2x384xf32>
    %cst_72 = arith.constant dense<0.000000e+00> : vector<2x384xf32>
    %205 = tpu.matmul %197, %80, %cst_72 {dimension_numbers = #tpu.dot_dimension_numbers<[1], [0], [0], [1], [0, 0, 1, 1], [], []>} : vector<2x128xf32>, vector<128x384xf32>, vector<2x384xf32> -> vector<2x384xf32>
    %206 = vector.broadcast %81 : vector<1x384xf32> to vector<2x384xf32>
    %207 = arith.addf %205, %206 : vector<2x384xf32>
    %208 = vector.extract_strided_slice %204 {offsets = [0, 0], sizes = [2, 256], strides = [1, 1]} : vector<2x384xf32> to vector<2x256xf32>
    %209 = vector.extract_strided_slice %207 {offsets = [0, 0], sizes = [2, 256], strides = [1, 1]} : vector<2x384xf32> to vector<2x256xf32>
    %210 = arith.addf %208, %209 : vector<2x256xf32>
    %211 = arith.negf %210 : vector<2x256xf32>
    %212 = math.exp %211 : vector<2x256xf32>
    %cst_73 = arith.constant 1.000000e+00 : f32
    %213 = vector.broadcast %cst_73 : f32 to vector<2x256xf32>
    %214 = arith.addf %213, %212 : vector<2x256xf32>
    %215 = arith.divf %213, %214 : vector<2x256xf32>
    %216 = vector.extract_strided_slice %215 {offsets = [0, 0], sizes = [2, 128], strides = [1, 1]} : vector<2x256xf32> to vector<2x128xf32>
    %217 = vector.extract_strided_slice %215 {offsets = [0, 128], sizes = [2, 128], strides = [1, 1]} : vector<2x256xf32> to vector<2x128xf32>
    %218 = vector.extract_strided_slice %204 {offsets = [0, 256], sizes = [2, 128], strides = [1, 1]} : vector<2x384xf32> to vector<2x128xf32>
    %219 = vector.extract_strided_slice %207 {offsets = [0, 256], sizes = [2, 128], strides = [1, 1]} : vector<2x384xf32> to vector<2x128xf32>
    %220 = arith.mulf %216, %219 : vector<2x128xf32>
    %221 = arith.addf %218, %220 : vector<2x128xf32>
    %222 = math.tanh %221 : vector<2x128xf32>
    %cst_74 = arith.constant 1.000000e+00 : f32
    %223 = vector.broadcast %cst_74 : f32 to vector<2x128xf32>
    %224 = arith.subf %223, %217 : vector<2x128xf32>
    %225 = arith.mulf %224, %222 : vector<2x128xf32>
    %226 = arith.mulf %217, %197 : vector<2x128xf32>
    %227 = arith.addf %225, %226 : vector<2x128xf32>
    %228 = arith.index_cast %c4_i32 : i32 to index
    %c0_75 = arith.constant 0 : index
    %c0_76 = arith.constant 0 : index
    %229 = vector.load %arg14[%228, %c0_75, %c0_76] : memref<8x2x128xf32, #tpu.memory_space<vmem>>, vector<1x2x128xf32>
    %230 = vector.shape_cast %229 : vector<1x2x128xf32> to vector<2x128xf32>
    %231 = vector.shape_cast %227 : vector<2x128xf32> to vector<1x2x128xf32>
    tpu.vector_store %arg14[%228, %c0_75, %c0_76], %231 {strides = array<i32>} : memref<8x2x128xf32, #tpu.memory_space<vmem>>, vector<1x2x128xf32>,
    %c5_i32 = arith.constant 5 : i32
    %232 = arith.index_cast %c5_i32 : i32 to index
    %c0_77 = arith.constant 0 : index
    %c0_78 = arith.constant 0 : index
    %233 = vector.load %arg13[%232, %c0_77, %c0_78] : memref<8x2x384xf32, #tpu.memory_space<vmem>>, vector<1x2x384xf32>
    %234 = vector.shape_cast %233 : vector<1x2x384xf32> to vector<2x384xf32>
    %cst_79 = arith.constant dense<0.000000e+00> : vector<2x384xf32>
    %235 = tpu.matmul %227, %80, %cst_79 {dimension_numbers = #tpu.dot_dimension_numbers<[1], [0], [0], [1], [0, 0, 1, 1], [], []>} : vector<2x128xf32>, vector<128x384xf32>, vector<2x384xf32> -> vector<2x384xf32>
    %236 = vector.broadcast %81 : vector<1x384xf32> to vector<2x384xf32>
    %237 = arith.addf %235, %236 : vector<2x384xf32>
    %238 = vector.extract_strided_slice %234 {offsets = [0, 0], sizes = [2, 256], strides = [1, 1]} : vector<2x384xf32> to vector<2x256xf32>
    %239 = vector.extract_strided_slice %237 {offsets = [0, 0], sizes = [2, 256], strides = [1, 1]} : vector<2x384xf32> to vector<2x256xf32>
    %240 = arith.addf %238, %239 : vector<2x256xf32>
    %241 = arith.negf %240 : vector<2x256xf32>
    %242 = math.exp %241 : vector<2x256xf32>
    %cst_80 = arith.constant 1.000000e+00 : f32
    %243 = vector.broadcast %cst_80 : f32 to vector<2x256xf32>
    %244 = arith.addf %243, %242 : vector<2x256xf32>
    %245 = arith.divf %243, %244 : vector<2x256xf32>
    %246 = vector.extract_strided_slice %245 {offsets = [0, 0], sizes = [2, 128], strides = [1, 1]} : vector<2x256xf32> to vector<2x128xf32>
    %247 = vector.extract_strided_slice %245 {offsets = [0, 128], sizes = [2, 128], strides = [1, 1]} : vector<2x256xf32> to vector<2x128xf32>
    %248 = vector.extract_strided_slice %234 {offsets = [0, 256], sizes = [2, 128], strides = [1, 1]} : vector<2x384xf32> to vector<2x128xf32>
    %249 = vector.extract_strided_slice %237 {offsets = [0, 256], sizes = [2, 128], strides = [1, 1]} : vector<2x384xf32> to vector<2x128xf32>
    %250 = arith.mulf %246, %249 : vector<2x128xf32>
    %251 = arith.addf %248, %250 : vector<2x128xf32>
    %252 = math.tanh %251 : vector<2x128xf32>
    %cst_81 = arith.constant 1.000000e+00 : f32
    %253 = vector.broadcast %cst_81 : f32 to vector<2x128xf32>
    %254 = arith.subf %253, %247 : vector<2x128xf32>
    %255 = arith.mulf %254, %252 : vector<2x128xf32>
    %256 = arith.mulf %247, %227 : vector<2x128xf32>
    %257 = arith.addf %255, %256 : vector<2x128xf32>
    %258 = arith.index_cast %c5_i32 : i32 to index
    %c0_82 = arith.constant 0 : index
    %c0_83 = arith.constant 0 : index
    %259 = vector.load %arg14[%258, %c0_82, %c0_83] : memref<8x2x128xf32, #tpu.memory_space<vmem>>, vector<1x2x128xf32>
    %260 = vector.shape_cast %259 : vector<1x2x128xf32> to vector<2x128xf32>
    %261 = vector.shape_cast %257 : vector<2x128xf32> to vector<1x2x128xf32>
    tpu.vector_store %arg14[%258, %c0_82, %c0_83], %261 {strides = array<i32>} : memref<8x2x128xf32, #tpu.memory_space<vmem>>, vector<1x2x128xf32>,
    %c6_i32 = arith.constant 6 : i32
    %262 = arith.index_cast %c6_i32 : i32 to index
    %c0_84 = arith.constant 0 : index
    %c0_85 = arith.constant 0 : index
    %263 = vector.load %arg13[%262, %c0_84, %c0_85] : memref<8x2x384xf32, #tpu.memory_space<vmem>>, vector<1x2x384xf32>
    %264 = vector.shape_cast %263 : vector<1x2x384xf32> to vector<2x384xf32>
    %cst_86 = arith.constant dense<0.000000e+00> : vector<2x384xf32>
    %265 = tpu.matmul %257, %80, %cst_86 {dimension_numbers = #tpu.dot_dimension_numbers<[1], [0], [0], [1], [0, 0, 1, 1], [], []>} : vector<2x128xf32>, vector<128x384xf32>, vector<2x384xf32> -> vector<2x384xf32>
    %266 = vector.broadcast %81 : vector<1x384xf32> to vector<2x384xf32>
    %267 = arith.addf %265, %266 : vector<2x384xf32>
    %268 = vector.extract_strided_slice %264 {offsets = [0, 0], sizes = [2, 256], strides = [1, 1]} : vector<2x384xf32> to vector<2x256xf32>
    %269 = vector.extract_strided_slice %267 {offsets = [0, 0], sizes = [2, 256], strides = [1, 1]} : vector<2x384xf32> to vector<2x256xf32>
    %270 = arith.addf %268, %269 : vector<2x256xf32>
    %271 = arith.negf %270 : vector<2x256xf32>
    %272 = math.exp %271 : vector<2x256xf32>
    %cst_87 = arith.constant 1.000000e+00 : f32
    %273 = vector.broadcast %cst_87 : f32 to vector<2x256xf32>
    %274 = arith.addf %273, %272 : vector<2x256xf32>
    %275 = arith.divf %273, %274 : vector<2x256xf32>
    %276 = vector.extract_strided_slice %275 {offsets = [0, 0], sizes = [2, 128], strides = [1, 1]} : vector<2x256xf32> to vector<2x128xf32>
    %277 = vector.extract_strided_slice %275 {offsets = [0, 128], sizes = [2, 128], strides = [1, 1]} : vector<2x256xf32> to vector<2x128xf32>
    %278 = vector.extract_strided_slice %264 {offsets = [0, 256], sizes = [2, 128], strides = [1, 1]} : vector<2x384xf32> to vector<2x128xf32>
    %279 = vector.extract_strided_slice %267 {offsets = [0, 256], sizes = [2, 128], strides = [1, 1]} : vector<2x384xf32> to vector<2x128xf32>
    %280 = arith.mulf %276, %279 : vector<2x128xf32>
    %281 = arith.addf %278, %280 : vector<2x128xf32>
    %282 = math.tanh %281 : vector<2x128xf32>
    %cst_88 = arith.constant 1.000000e+00 : f32
    %283 = vector.broadcast %cst_88 : f32 to vector<2x128xf32>
    %284 = arith.subf %283, %277 : vector<2x128xf32>
    %285 = arith.mulf %284, %282 : vector<2x128xf32>
    %286 = arith.mulf %277, %257 : vector<2x128xf32>
    %287 = arith.addf %285, %286 : vector<2x128xf32>
    %288 = arith.index_cast %c6_i32 : i32 to index
    %c0_89 = arith.constant 0 : index
    %c0_90 = arith.constant 0 : index
    %289 = vector.load %arg14[%288, %c0_89, %c0_90] : memref<8x2x128xf32, #tpu.memory_space<vmem>>, vector<1x2x128xf32>
    %290 = vector.shape_cast %289 : vector<1x2x128xf32> to vector<2x128xf32>
    %291 = vector.shape_cast %287 : vector<2x128xf32> to vector<1x2x128xf32>
    tpu.vector_store %arg14[%288, %c0_89, %c0_90], %291 {strides = array<i32>} : memref<8x2x128xf32, #tpu.memory_space<vmem>>, vector<1x2x128xf32>,
    %c7_i32 = arith.constant 7 : i32
    %292 = arith.index_cast %c7_i32 : i32 to index
    %c0_91 = arith.constant 0 : index
    %c0_92 = arith.constant 0 : index
    %293 = vector.load %arg13[%292, %c0_91, %c0_92] : memref<8x2x384xf32, #tpu.memory_space<vmem>>, vector<1x2x384xf32>
    %294 = vector.shape_cast %293 : vector<1x2x384xf32> to vector<2x384xf32>
    %cst_93 = arith.constant dense<0.000000e+00> : vector<2x384xf32>
    %295 = tpu.matmul %287, %80, %cst_93 {dimension_numbers = #tpu.dot_dimension_numbers<[1], [0], [0], [1], [0, 0, 1, 1], [], []>} : vector<2x128xf32>, vector<128x384xf32>, vector<2x384xf32> -> vector<2x384xf32>
    %296 = vector.broadcast %81 : vector<1x384xf32> to vector<2x384xf32>
    %297 = arith.addf %295, %296 : vector<2x384xf32>
    %298 = vector.extract_strided_slice %294 {offsets = [0, 0], sizes = [2, 256], strides = [1, 1]} : vector<2x384xf32> to vector<2x256xf32>
    %299 = vector.extract_strided_slice %297 {offsets = [0, 0], sizes = [2, 256], strides = [1, 1]} : vector<2x384xf32> to vector<2x256xf32>
    %300 = arith.addf %298, %299 : vector<2x256xf32>
    %301 = arith.negf %300 : vector<2x256xf32>
    %302 = math.exp %301 : vector<2x256xf32>
    %cst_94 = arith.constant 1.000000e+00 : f32
    %303 = vector.broadcast %cst_94 : f32 to vector<2x256xf32>
    %304 = arith.addf %303, %302 : vector<2x256xf32>
    %305 = arith.divf %303, %304 : vector<2x256xf32>
    %306 = vector.extract_strided_slice %305 {offsets = [0, 0], sizes = [2, 128], strides = [1, 1]} : vector<2x256xf32> to vector<2x128xf32>
    %307 = vector.extract_strided_slice %305 {offsets = [0, 128], sizes = [2, 128], strides = [1, 1]} : vector<2x256xf32> to vector<2x128xf32>
    %308 = vector.extract_strided_slice %294 {offsets = [0, 256], sizes = [2, 128], strides = [1, 1]} : vector<2x384xf32> to vector<2x128xf32>
    %309 = vector.extract_strided_slice %297 {offsets = [0, 256], sizes = [2, 128], strides = [1, 1]} : vector<2x384xf32> to vector<2x128xf32>
    %310 = arith.mulf %306, %309 : vector<2x128xf32>
    %311 = arith.addf %308, %310 : vector<2x128xf32>
    %312 = math.tanh %311 : vector<2x128xf32>
    %cst_95 = arith.constant 1.000000e+00 : f32
    %313 = vector.broadcast %cst_95 : f32 to vector<2x128xf32>
    %314 = arith.subf %313, %307 : vector<2x128xf32>
    %315 = arith.mulf %314, %312 : vector<2x128xf32>
    %316 = arith.mulf %307, %287 : vector<2x128xf32>
    %317 = arith.addf %315, %316 : vector<2x128xf32>
    %318 = arith.index_cast %c7_i32 : i32 to index
    %c0_96 = arith.constant 0 : index
    %c0_97 = arith.constant 0 : index
    %319 = vector.load %arg14[%318, %c0_96, %c0_97] : memref<8x2x128xf32, #tpu.memory_space<vmem>>, vector<1x2x128xf32>
    %320 = vector.shape_cast %319 : vector<1x2x128xf32> to vector<2x128xf32>
    %321 = vector.shape_cast %317 : vector<2x128xf32> to vector<1x2x128xf32>
    tpu.vector_store %arg14[%318, %c0_96, %c0_97], %321 {strides = array<i32>} : memref<8x2x128xf32, #tpu.memory_space<vmem>>, vector<1x2x128xf32>,
    %c8_i32 = arith.constant 8 : i32
    %c0_98 = arith.constant 0 : index
    %c0_99 = arith.constant 0 : index
    %322 = vector.load %arg12[%c0_98, %c0_99] : memref<2x128xf32, #tpu.memory_space<vmem>>, vector<2x128xf32>
    tpu.vector_store %arg12[%c0_98, %c0_99], %317 {strides = array<i32>} : memref<2x128xf32, #tpu.memory_space<vmem>>, vector<2x128xf32>,
    %c0_100 = arith.constant 0 : index
    %c0_101 = arith.constant 0 : index
    %c0_102 = arith.constant 0 : index
    %323 = vector.load %arg14[%c0_100, %c0_101, %c0_102] : memref<8x2x128xf32, #tpu.memory_space<vmem>>, vector<8x2x128xf32>
    %324 = vector.extract_strided_slice %323 {offsets = [0, 0, 0], sizes = [1, 2, 128], strides = [1, 1, 1]} : vector<8x2x128xf32> to vector<1x2x128xf32>
    %325 = vector.shape_cast %324 : vector<1x2x128xf32> to vector<2x128xf32>
    %326 = vector.shape_cast %325 : vector<2x128xf32> to vector<2x1x128xf32>
    %c0_103 = arith.constant 0 : index
    %c0_104 = arith.constant 0 : index
    %c0_105 = arith.constant 0 : index
    %327 = vector.load %arg11[%c0_103, %c0_104, %c0_105] : memref<2x8x128xf32, #tpu.memory_space<vmem>>, vector<2x1x128xf32>
    tpu.vector_store %arg11[%c0_103, %c0_104, %c0_105], %326 {strides = array<i32>} : memref<2x8x128xf32, #tpu.memory_space<vmem>>, vector<2x1x128xf32>,
    %328 = vector.extract_strided_slice %323 {offsets = [1, 0, 0], sizes = [1, 2, 128], strides = [1, 1, 1]} : vector<8x2x128xf32> to vector<1x2x128xf32>
    %329 = vector.shape_cast %328 : vector<1x2x128xf32> to vector<2x128xf32>
    %330 = vector.shape_cast %329 : vector<2x128xf32> to vector<2x1x128xf32>
    %c0_106 = arith.constant 0 : index
    %c1_107 = arith.constant 1 : index
    %c0_108 = arith.constant 0 : index
    %331 = vector.load %arg11[%c0_106, %c1_107, %c0_108] : memref<2x8x128xf32, #tpu.memory_space<vmem>>, vector<2x1x128xf32>
    tpu.vector_store %arg11[%c0_106, %c1_107, %c0_108], %330 {strides = array<i32>} : memref<2x8x128xf32, #tpu.memory_space<vmem>>, vector<2x1x128xf32>,
    %332 = vector.extract_strided_slice %323 {offsets = [2, 0, 0], sizes = [1, 2, 128], strides = [1, 1, 1]} : vector<8x2x128xf32> to vector<1x2x128xf32>
    %333 = vector.shape_cast %332 : vector<1x2x128xf32> to vector<2x128xf32>
    %334 = vector.shape_cast %333 : vector<2x128xf32> to vector<2x1x128xf32>
    %c0_109 = arith.constant 0 : index
    %c2_110 = arith.constant 2 : index
    %c0_111 = arith.constant 0 : index
    %335 = vector.load %arg11[%c0_109, %c2_110, %c0_111] : memref<2x8x128xf32, #tpu.memory_space<vmem>>, vector<2x1x128xf32>
    tpu.vector_store %arg11[%c0_109, %c2_110, %c0_111], %334 {strides = array<i32>} : memref<2x8x128xf32, #tpu.memory_space<vmem>>, vector<2x1x128xf32>,
    %336 = vector.extract_strided_slice %323 {offsets = [3, 0, 0], sizes = [1, 2, 128], strides = [1, 1, 1]} : vector<8x2x128xf32> to vector<1x2x128xf32>
    %337 = vector.shape_cast %336 : vector<1x2x128xf32> to vector<2x128xf32>
    %338 = vector.shape_cast %337 : vector<2x128xf32> to vector<2x1x128xf32>
    %c0_112 = arith.constant 0 : index
    %c3_113 = arith.constant 3 : index
    %c0_114 = arith.constant 0 : index
    %339 = vector.load %arg11[%c0_112, %c3_113, %c0_114] : memref<2x8x128xf32, #tpu.memory_space<vmem>>, vector<2x1x128xf32>
    tpu.vector_store %arg11[%c0_112, %c3_113, %c0_114], %338 {strides = array<i32>} : memref<2x8x128xf32, #tpu.memory_space<vmem>>, vector<2x1x128xf32>,
    %340 = vector.extract_strided_slice %323 {offsets = [4, 0, 0], sizes = [1, 2, 128], strides = [1, 1, 1]} : vector<8x2x128xf32> to vector<1x2x128xf32>
    %341 = vector.shape_cast %340 : vector<1x2x128xf32> to vector<2x128xf32>
    %342 = vector.shape_cast %341 : vector<2x128xf32> to vector<2x1x128xf32>
    %c0_115 = arith.constant 0 : index
    %c4_116 = arith.constant 4 : index
    %c0_117 = arith.constant 0 : index
    %343 = vector.load %arg11[%c0_115, %c4_116, %c0_117] : memref<2x8x128xf32, #tpu.memory_space<vmem>>, vector<2x1x128xf32>
    tpu.vector_store %arg11[%c0_115, %c4_116, %c0_117], %342 {strides = array<i32>} : memref<2x8x128xf32, #tpu.memory_space<vmem>>, vector<2x1x128xf32>,
    %344 = vector.extract_strided_slice %323 {offsets = [5, 0, 0], sizes = [1, 2, 128], strides = [1, 1, 1]} : vector<8x2x128xf32> to vector<1x2x128xf32>
    %345 = vector.shape_cast %344 : vector<1x2x128xf32> to vector<2x128xf32>
    %346 = vector.shape_cast %345 : vector<2x128xf32> to vector<2x1x128xf32>
    %c0_118 = arith.constant 0 : index
    %c5_119 = arith.constant 5 : index
    %c0_120 = arith.constant 0 : index
    %347 = vector.load %arg11[%c0_118, %c5_119, %c0_120] : memref<2x8x128xf32, #tpu.memory_space<vmem>>, vector<2x1x128xf32>
    tpu.vector_store %arg11[%c0_118, %c5_119, %c0_120], %346 {strides = array<i32>} : memref<2x8x128xf32, #tpu.memory_space<vmem>>, vector<2x1x128xf32>,
    %348 = vector.extract_strided_slice %323 {offsets = [6, 0, 0], sizes = [1, 2, 128], strides = [1, 1, 1]} : vector<8x2x128xf32> to vector<1x2x128xf32>
    %349 = vector.shape_cast %348 : vector<1x2x128xf32> to vector<2x128xf32>
    %350 = vector.shape_cast %349 : vector<2x128xf32> to vector<2x1x128xf32>
    %c0_121 = arith.constant 0 : index
    %c6_122 = arith.constant 6 : index
    %c0_123 = arith.constant 0 : index
    %351 = vector.load %arg11[%c0_121, %c6_122, %c0_123] : memref<2x8x128xf32, #tpu.memory_space<vmem>>, vector<2x1x128xf32>
    tpu.vector_store %arg11[%c0_121, %c6_122, %c0_123], %350 {strides = array<i32>} : memref<2x8x128xf32, #tpu.memory_space<vmem>>, vector<2x1x128xf32>,
    %352 = vector.extract_strided_slice %323 {offsets = [7, 0, 0], sizes = [1, 2, 128], strides = [1, 1, 1]} : vector<8x2x128xf32> to vector<1x2x128xf32>
    %353 = vector.shape_cast %352 : vector<1x2x128xf32> to vector<2x128xf32>
    %354 = vector.shape_cast %353 : vector<2x128xf32> to vector<2x1x128xf32>
    %c0_124 = arith.constant 0 : index
    %c7_125 = arith.constant 7 : index
    %c0_126 = arith.constant 0 : index
    %355 = vector.load %arg11[%c0_124, %c7_125, %c0_126] : memref<2x8x128xf32, #tpu.memory_space<vmem>>, vector<2x1x128xf32>
    tpu.vector_store %arg11[%c0_124, %c7_125, %c0_126], %354 {strides = array<i32>} : memref<2x8x128xf32, #tpu.memory_space<vmem>>, vector<2x1x128xf32>,
    return
  }
  func.func @transform_0(%arg0: i32) -> (i32, i32, i32) {
    %c0_i32 = arith.constant 0 : i32
    %c0_i32_0 = arith.constant 0 : i32
    %c0_i32_1 = arith.constant 0 : i32
    return %arg0, %c0_i32, %c0_i32_0 : i32, i32, i32
  }
  func.func @transform_1(%arg0: i32) -> (i32, i32) {
    %c0_i32 = arith.constant 0 : i32
    %c0_i32_0 = arith.constant 0 : i32
    return %arg0, %c0_i32 : i32, i32
  }
  func.func @transform_2(%arg0: i32) -> (i32, i32) {
    %c0_i32 = arith.constant 0 : i32
    %c0_i32_0 = arith.constant 0 : i32
    %c0_i32_1 = arith.constant 0 : i32
    return %c0_i32, %c0_i32_0 : i32, i32
  }
  func.func @transform_3(%arg0: i32) -> (i32, i32) {
    %c0_i32 = arith.constant 0 : i32
    %c0_i32_0 = arith.constant 0 : i32
    %c0_i32_1 = arith.constant 0 : i32
    return %c0_i32, %c0_i32_0 : i32, i32
  }
  func.func @transform_4(%arg0: i32) -> (i32, i32) {
    %c0_i32 = arith.constant 0 : i32
    %c0_i32_0 = arith.constant 0 : i32
    %c0_i32_1 = arith.constant 0 : i32
    return %c0_i32, %c0_i32_0 : i32, i32
  }
  func.func @transform_5(%arg0: i32) -> (i32, i32) {
    %c0_i32 = arith.constant 0 : i32
    %c0_i32_0 = arith.constant 0 : i32
    %c0_i32_1 = arith.constant 0 : i32
    return %c0_i32, %c0_i32_0 : i32, i32
  }
  func.func @transform_6(%arg0: i32) -> (i32, i32) {
    %c0_i32 = arith.constant 0 : i32
    %c0_i32_0 = arith.constant 0 : i32
    %c0_i32_1 = arith.constant 0 : i32
    return %c0_i32, %c0_i32_0 : i32, i32
  }
  func.func @transform_7(%arg0: i32) -> (i32, i32) {
    %c0_i32 = arith.constant 0 : i32
    %c0_i32_0 = arith.constant 0 : i32
    %c0_i32_1 = arith.constant 0 : i32
    return %c0_i32, %c0_i32_0 : i32, i32
  }
  func.func @transform_8(%arg0: i32) -> (i32, i32) {
    %c0_i32 = arith.constant 0 : i32
    %c0_i32_0 = arith.constant 0 : i32
    %c0_i32_1 = arith.constant 0 : i32
    return %c0_i32, %c0_i32_0 : i32, i32
  }
  func.func @transform_9(%arg0: i32) -> (i32, i32) {
    %c0_i32 = arith.constant 0 : i32
    %c0_i32_0 = arith.constant 0 : i32
    %c0_i32_1 = arith.constant 0 : i32
    return %c0_i32, %c0_i32_0 : i32, i32
  }
  func.func @transform_10(%arg0: i32) -> (i32, i32, i32) {
    %c0_i32 = arith.constant 0 : i32
    %c0_i32_0 = arith.constant 0 : i32
    %c0_i32_1 = arith.constant 0 : i32
    return %arg0, %c0_i32, %c0_i32_0 : i32, i32, i32
  }
  func.func @transform_11(%arg0: i32) -> (i32, i32) {
    %c0_i32 = arith.constant 0 : i32
    %c0_i32_0 = arith.constant 0 : i32
    return %arg0, %c0_i32 : i32, i32
  }
}

</mosaic_0001>

<bundles_post_ra>
// kernel: tpu_custom_call.1
= control target key start
LH: loop header
LB: loop body
LE: loop exit
PB: predicated region body
PF: predicated region fallthrough
CT: control target
= control target key end

     0   :  { %17 = vsyncpa [#allocation5], 0  ;;  %s4624_s0 = inlined_call_operand.hbm [shape: f32[2,8,128], index: 0, kind: input, shape index: {}]   ;;  %s4625_s1 = inlined_call_operand.hbm [shape: f32[2,128], index: 1, kind: input, shape index: {}]   ;;  %s4626_s2 = inlined_call_operand.hbm [shape: f32[128,128], index: 2, kind: input, shape index: {}]   ;;  %s4627_s3 = inlined_call_operand.hbm [shape: f32[128,128], index: 3, kind: input, shape index: {}]   ;;  %s4628_s4 = inlined_call_operand.vmem [shape: f32[1,128], index: 4, kind: input, shape index: {}]   ;;  %s4629_s5 = inlined_call_operand.vmem [shape: f32[1,128], index: 5, kind: input, shape index: {}]   ;;  %s4630_s6 = inlined_call_operand.hbm [shape: f32[128,384], index: 6, kind: input, shape index: {}]   ;;  %s4631_s7 = inlined_call_operand.hbm [shape: f32[128,384], index: 7, kind: input, shape index: {}]   ;;  %s4632_s8 = inlined_call_operand.vmem [shape: f32[1,384], index: 8, kind: input, shape index: {}]   ;;  %s4633_s9 = inlined_call_operand.vmem [shape: f32[1,384], index: 9, kind: input, shape index: {}]   ;;  %s4634_s10 = inlined_call_operand.hbm [shape: f32[2,8,128], index: 10, kind: output, shape index: {0}]   ;;  %s4635_s11 = inlined_call_operand.hbm [shape: f32[2,128], index: 11, kind: output, shape index: {1}]  }
   0x1   :  { %18 = vsyncpa [#allocation8], 0 }
   0x2   :  { %19 = vsyncpa [#allocation11], 0 }
   0x3   :  { %20 = vsyncpa [#allocation14], 0 }
   0x4   :  { %21 = vsyncpa [#allocation6], 0 }
   0x5   :  { %22 = vsyncpa [#allocation17], 0  ;;  %s3936_s17 = smov [#allocation7]   ;;  %s3748_s21 = scalar_lea.hbm %s4625_s1, 32 }
   0x6   :  { %s41_s18 = sshll.u32 %s3936_s17, 4  ;;  %p3749_p0 = scmp.ne.s32.totalorder %s4625_s1, %s3748_s21  ;;  %s42_s18 = int_to_ptr.vmem [resolvable:$true] %s41_s18 }
   0x7   :  { %p3752_p1 = scmp.lt.u32.totalorder %s3748_s21, %s4625_s1 }
   0x9   :  { %p3754_p2 = pnand %p3752_p1, %p3749_p0 }
   0xb   :  { %3757 = shalt.err (!%p3754_p2)
}
   0xc   :  { %s3758_s26 = scalar_lea.vmem %s42_s18, 32  ;;  %p3763_p4 = scmp.lt.s32.totalorder %s42_s18, %s42_s18 }
   0xd   :  { %p3759_p3 = scmp.ne.s32.totalorder %s42_s18, %s3758_s26  ;;  %p3764_p5 = scmp.lt.s32.totalorder %s3758_s26, %s3758_s26 }
   0xf   :  { %p3765_p6 = por %p3764_p5, %p3763_p4 }
  0x11   :  { %p3766_p7 = pnand %p3765_p6, %p3759_p3 }
  0x13   :  { %3769 = shalt.err (!%p3766_p7)
}
  0x14   :  { %44 = dma.hbm_to_vmem [thread:$0]  %s4625_s1, 32, %s42_s18, [#allocation8]  }
  0x15   :  { %s3937_s29 = smov [#allocation10]   ;;  %s3938_s12 = smov [#allocation4]  }
  0x16   :  { %s62_s30 = sshll.u32 %s3937_s29, 4  ;;  %s28_s13 = sshll.u32 %s3938_s12, 4  ;;  %s63_s30 = int_to_ptr.vmem [resolvable:$true] %s62_s30  ;;  %s29_s13 = int_to_ptr.vmem [resolvable:$true] %s28_s13 }
  0x17   :  { %s3770_s16 = scalar_lea.hbm %s4627_s3, 2048 }
  0x18   :  { %p3771_p8 = scmp.ne.s32.totalorder %s4627_s3, %s3770_s16  ;;  %p3774_p9 = scmp.lt.u32.totalorder %s3770_s16, %s4627_s3 }
  0x1a   :  { %p3776_p10 = pnand %p3774_p9, %p3771_p8 }
  0x1c   :  { %3779 = shalt.err (!%p3776_p10)
}
  0x1d   :  { %s3780_s1 = scalar_lea.vmem %s63_s30, 2048  ;;  %p3785_p12 = scmp.lt.s32.totalorder %s63_s30, %s63_s30 }
  0x1e   :  { %p3781_p11 = scmp.ne.s32.totalorder %s63_s30, %s3780_s1  ;;  %p3786_p13 = scmp.lt.s32.totalorder %s3780_s1, %s3780_s1 }
  0x20   :  { %p3787_p0 = por %p3786_p13, %p3785_p12 }
  0x22   :  { %p3788_p1 = pnand %p3787_p0, %p3781_p11 }
  0x24   :  { %3791 = shalt.err (!%p3788_p1)
}
  0x25   :  { %s3939_s18 = smov 128   ;;  %s3940_s22 = smov 8  }
  0x26   :  { %68 = dma.hbm_to_vmem [thread:$0]  %s4627_s3, 2048, %s63_s30, [#allocation11], %s3939_s18, %s3939_s18, %s3940_s22  }
  0x27   :  { %s3792_s27 = scalar_lea.hbm %s4624_s0, 256 }
  0x28   :  { %p3793_p2 = scmp.ne.s32.totalorder %s4624_s0, %s3792_s27  ;;  %p3796_p3 = scmp.lt.u32.totalorder %s3792_s27, %s4624_s0 }
  0x2a   :  { %p3798_p4 = pnand %p3796_p3, %p3793_p2 }
  0x2c   :  { %3801 = shalt.err (!%p3798_p4)
}
  0x2d   :  { %s3802_s15 = scalar_lea.vmem %s29_s13, 256  ;;  %p3807_p6 = scmp.lt.s32.totalorder %s29_s13, %s29_s13 }
  0x2e   :  { %p3803_p5 = scmp.ne.s32.totalorder %s29_s13, %s3802_s15  ;;  %p3808_p7 = scmp.lt.s32.totalorder %s3802_s15, %s3802_s15 }
  0x30   :  { %p3809_p8 = por %p3808_p7, %p3807_p6 }
  0x32   :  { %p3810_p9 = pnand %p3809_p8, %p3803_p5 }
  0x34   :  { %3813 = shalt.err (!%p3810_p9)
}
  0x35   :  { %34 = dma.hbm_to_vmem [thread:$0]  %s4624_s0, 256, %s29_s13, [#allocation5], %s3939_s18, %s3939_s18, %s3940_s22  }
  0x36   :  { %s3941_s16 = smov [#allocation9]   ;;  %s3942_s19 = smov [#allocation12]  }
  0x37   :  { %s50_s17 = sshll.u32 %s3941_s16, 4  ;;  %s78_s20 = sshll.u32 %s3942_s19, 4  ;;  %s51_s17 = int_to_ptr.vmem [resolvable:$true] %s50_s17  ;;  %s79_s20 = int_to_ptr.vmem [resolvable:$true] %s78_s20 }
  0x38   :  { %s3814_s23 = scalar_lea.hbm %s4626_s2, 2048 }
  0x39   :  { %p3815_p10 = scmp.ne.s32.totalorder %s4626_s2, %s3814_s23  ;;  %p3818_p11 = scmp.lt.u32.totalorder %s3814_s23, %s4626_s2 }
  0x3b   :  { %p3820_p12 = pnand %p3818_p11, %p3815_p10 }
  0x3d   :  { %3823 = shalt.err (!%p3820_p12)
}
  0x3e   :  { %s3824_s0 = scalar_lea.vmem %s51_s17, 2048  ;;  %p3829_p0 = scmp.lt.s32.totalorder %s51_s17, %s51_s17 }
  0x3f   :  { %p3825_p13 = scmp.ne.s32.totalorder %s51_s17, %s3824_s0  ;;  %p3830_p1 = scmp.lt.s32.totalorder %s3824_s0, %s3824_s0 }
  0x41   :  { %p3831_p2 = por %p3830_p1, %p3829_p0 }
  0x43   :  { %p3832_p3 = pnand %p3831_p2, %p3825_p13 }
  0x45   :  { %3835 = shalt.err (!%p3832_p3)
}
  0x46   :  { %56 = dma.hbm_to_vmem [thread:$0]  %s4626_s2, 2048, %s51_s17, [#allocation8], %s3939_s18, %s3939_s18, %s3940_s22  }
  0x47   :  { %s3836_s14 = scalar_lea.hbm %s4630_s6, 6144 }
  0x48   :  { %p3837_p4 = scmp.ne.s32.totalorder %s4630_s6, %s3836_s14  ;;  %p3840_p5 = scmp.lt.u32.totalorder %s3836_s14, %s4630_s6 }
  0x4a   :  { %p3842_p6 = pnand %p3840_p5, %p3837_p4 }
  0x4c   :  { %3845 = shalt.err (!%p3842_p6)
}
  0x4d   :  { %s3846_s19 = scalar_lea.vmem %s79_s20, 6144  ;;  %p3851_p8 = scmp.lt.s32.totalorder %s79_s20, %s79_s20 }
  0x4e   :  { %p3847_p7 = scmp.ne.s32.totalorder %s79_s20, %s3846_s19  ;;  %p3852_p9 = scmp.lt.s32.totalorder %s3846_s19, %s3846_s19 }
  0x50   :  { %p3853_p10 = por %p3852_p9, %p3851_p8 }
  0x52   :  { %p3854_p11 = pnand %p3853_p10, %p3847_p7 }
  0x54   :  { %3857 = shalt.err (!%p3854_p11)
}
  0x55   :  { %s3943_s2 = smov 384   ;;  %s3944_s17 = smov 24  }
  0x56   :  { %84 = dma.hbm_to_vmem [thread:$0]  %s4630_s6, 6144, %s79_s20, [#allocation11], %s3943_s2, %s3943_s2, %s3944_s17  }
  0x57   :  { %s3945_s23 = smov [#allocation13]   ;;  %s3858_s27 = scalar_lea.hbm %s4631_s7, 6144 }
  0x58   :  { %s90_s24 = sshll.u32 %s3945_s23, 4  ;;  %p3859_p12 = scmp.ne.s32.totalorder %s4631_s7, %s3858_s27  ;;  %s91_s24 = int_to_ptr.vmem [resolvable:$true] %s90_s24 }
  0x59   :  { %p3862_p13 = scmp.lt.u32.totalorder %s3858_s27, %s4631_s7 }
  0x5b   :  { %p3864_p0 = pnand %p3862_p13, %p3859_p12 }
  0x5d   :  { %3867 = shalt.err (!%p3864_p0)
}
  0x5e   :  { %s3868_s12 = scalar_lea.vmem %s91_s24, 6144  ;;  %p3873_p2 = scmp.lt.s32.totalorder %s91_s24, %s91_s24 }
  0x5f   :  { %p3869_p1 = scmp.ne.s32.totalorder %s91_s24, %s3868_s12  ;;  %p3874_p3 = scmp.lt.s32.totalorder %s3868_s12, %s3868_s12 }
  0x61   :  { %p3875_p4 = por %p3874_p3, %p3873_p2 }
  0x63   :  { %p3876_p5 = pnand %p3875_p4, %p3869_p1 }
  0x65   :  { %3879 = shalt.err (!%p3876_p5)
}
  0x66   :  { %96 = dma.hbm_to_vmem [thread:$0]  %s4631_s7, 6144, %s91_s24, [#allocation14], %s3943_s2, %s3943_s2, %s3944_s17  }
  0x67   :  { %3924 = dma.done.wait [#allocation5], 256  }
  0x68   :  { %3925 = vsyncadd [#allocation5], 4294967040 }
  0x69   :  { %3926 = dma.done.wait [#allocation8], 2080  }
  0x6a   :  { %3927 = vsyncadd [#allocation8], 4294965216 }
  0x6b   :  { %3928 = dma.done.wait [#allocation11], 8192  }
  0x6c   :  { %3929 = vsyncadd [#allocation11], 4294959104 }
  0x6d   :  { %3930 = dma.done.wait [#allocation14], 6144  }
  0x6e   :  { %3931 = vsyncadd [#allocation14], 4294961152  ;;  %v3946_v0 = vmov 0.0|0.0   ;;  %vm3947_vm0 = vmmov 0   ;;  %v3948_v1 = vmov 0.0   ;;  %v213_v2 = vld [vmem:[#allocation10] sm:$0xff]  ;;  %v303_v55 = vlaneseq }
  0x6f   :  { %3135 = vmatprep.subr.bf16.mxu1 %v3946_v0  ;;  %2785 = vmatprep.mubr.msk.f32.mxu1 %vm3947_vm0, %v3948_v1  ;;  %v214_v3 = vld [vmem:[#allocation10 + $0x8] sm:$0xff]  ;;  %v122_v4 = vld [vmem:[#allocation9] sm:$0xff]  ;;  %v215_v7 = vld [vmem:[#allocation10 + $0x10] sm:$0xff]  ;;  %v3949_v53 = vmov 1966171168   ;;  %vm654_vm1 = vcmask 1041409  }
  0x70   :  { %v3136_v5 = vpack.c.bf16 %v214_v3, %v213_v2  ;;  %v123_v6 = vld [vmem:[#allocation9 + $0x8] sm:$0xff]  ;;  %v216_v8 = vld [vmem:[#allocation10 + $0x18] sm:$0xff]  ;;  %v124_v10 = vld [vmem:[#allocation9 + $0x10] sm:$0xff]  ;;  %v301_v54 = vunpack.c.l.s4 %v3949_v53  ;;  %v4114_v57 = vshrl.u32 %v303_v55, 7  ;;  %vm656_vm2 = vcmask 1043459  }
  0x71   :  { %v3103_v9 = vpack.c.bf16 %v123_v6, %v122_v4  ;;  %v125_v11 = vld [vmem:[#allocation9 + $0x18] sm:$0xff]  ;;  %v3139_v12 = vpack.c.bf16 %v216_v8, %v215_v7  ;;  %v126_v14 = vld [vmem:[#allocation9 + $0x20] sm:$0xff]  ;;  %v127_v15 = vld [vmem:[#allocation9 + $0x28] sm:$0xff]  ;;  %vm658_vm3 = vcmask 1045509   ;;  %vm660_vm4 = vcmask 1047559  }
  0x72   :  { %3137 = vmatpush3.bf16.msra.mxu1 %v3136_v5  ;;  %v3107_v13 = vpack.c.bf16 %v125_v11, %v124_v10  ;;  %v217_v16 = vld [vmem:[#allocation10 + $0x20] sm:$0xff]  ;;  %v218_v17 = vld [vmem:[#allocation10 + $0x28] sm:$0xff]  ;;  %v3111_v18 = vpack.c.bf16 %v127_v15, %v126_v14  ;;  %v128_v20 = vld [vmem:[#allocation9 + $0x30] sm:$0xff]  ;;  %v302_v56 = vunpack.c.0.s8 %v301_v54  ;;  %v4118_v62 = vsub.s32 0, %v4114_v57 }
  0x73   :  { %3104 = vmatprep.subr.bf16.mxu0 %v3103_v9  ;;  %3138 = vmatprep.subr.bf16.mxu1 %v3946_v0  ;;  %v3142_v19 = vpack.c.bf16 %v218_v17, %v217_v16  ;;  %v129_v21 = vld [vmem:[#allocation9 + $0x38] sm:$0xff]  ;;  %v219_v22 = vld [vmem:[#allocation10 + $0x30] sm:$0xff]  ;;  %v130_v26 = vld [vmem:[#allocation9 + $0x40] sm:$0xff] }
  0x74   :  { %3106 = vmatpush3.bf16.msra.mxu0 %v3103_v9  ;;  %v220_v23 = vld [vmem:[#allocation10 + $0x38] sm:$0xff]  ;;  %v3115_v24 = vpack.c.bf16 %v129_v21, %v128_v20  ;;  %v131_v27 = vld [vmem:[#allocation9 + $0x48] sm:$0xff]  ;;  %v221_v29 = vld [vmem:[#allocation10 + $0x40] sm:$0xff]  ;;  %v305_v58 = vsub.s32 %v302_v56, %v4114_v57 }
  0x75   :  { %3108 = vmatprep.subr.bf16.mxu0 %v3107_v13  ;;  %v3145_v25 = vpack.c.bf16 %v220_v23, %v219_v22  ;;  %v4099_v28 = vld [vmem:[#allocation4] sm:$0xff]  ;;  %v3119_v31 = vpack.c.bf16 %v131_v27, %v130_v26  ;;  %v133_v34 = vld [vmem:[#allocation9 + $0x58] sm:$0xff]  ;;  %v134_v39 = vld [vmem:[#allocation9 + $0x60] sm:$0xff] }
  0x76   :  { %3140 = vmatpush3.bf16.msra.mxu1 %v3139_v12  ;;  %v222_v30 = vld [vmem:[#allocation10 + $0x48] sm:$0xff]  ;;  %2750 = vmatprep.mubr.f32.mxu0 %v4099_v28  ;;  %v132_v33 = vld [vmem:[#allocation9 + $0x50] sm:$0xff]  ;;  %v224_v36 = vld [vmem:[#allocation10 + $0x58] sm:$0xff] }
  0x77   :  { %3141 = vmatprep.subr.bf16.mxu1 %v3946_v0  ;;  %v3148_v32 = vpack.c.bf16 %v222_v30, %v221_v29  ;;  %v223_v35 = vld [vmem:[#allocation10 + $0x50] sm:$0xff]  ;;  %v3123_v37 = vpack.c.bf16 %v133_v34, %v132_v33  ;;  %v135_v40 = vld [vmem:[#allocation9 + $0x68] sm:$0xff]  ;;  %v225_v41 = vld [vmem:[#allocation10 + $0x60] sm:$0xff] }
  0x78   :  { %3110 = vmatpush3.bf16.msra.mxu0 %v3107_v13  ;;  %v3151_v38 = vpack.c.bf16 %v224_v36, %v223_v35  ;;  %v226_v42 = vld [vmem:[#allocation10 + $0x68] sm:$0xff]  ;;  %v3127_v43 = vpack.c.bf16 %v135_v40, %v134_v39  ;;  %v136_v45 = vld [vmem:[#allocation9 + $0x70] sm:$0xff]  ;;  %v137_v46 = vld [vmem:[#allocation9 + $0x78] sm:$0xff] }
  0x79   :  { %3112 = vmatprep.subr.bf16.mxu0 %v3111_v18  ;;  %v3154_v44 = vpack.c.bf16 %v226_v42, %v225_v41  ;;  %v227_v47 = vld [vmem:[#allocation10 + $0x70] sm:$0xff]  ;;  %v228_v48 = vld [vmem:[#allocation10 + $0x78] sm:$0xff]  ;;  %v3131_v49 = vpack.c.bf16 %v137_v46, %v136_v45  ;;  %v2495_v7 = vld [vmem:[%s4628_s4] ss:$0 sm:$0xff] }
  0x7a   :  { %3143 = vmatpush3.bf16.msra.mxu1 %v3142_v19  ;;  %v3157_v50 = vpack.c.bf16 %v228_v48, %v227_v47  ;;  %v4107_v51 = vld [vmem:[#allocation7] sm:$0x3]  ;;  %v4109_v52 = vld [vmem:[#allocation4 + $0x8] sm:$0xff]  ;;  %v2496_v13 = vld [vmem:[%s4629_s5] ss:$0 sm:$0xff] }
  0x7b   :  { %3144 = vmatprep.subr.bf16.mxu1 %v3946_v0  ;;  %v398_v19 = vld [vmem:[#allocation12 + $0x20] sm:$0xff]  ;;  %v397_v22 = vld [vmem:[#allocation12 + $0x18] sm:$0xff]  ;;  %v400_v26 = vld [vmem:[#allocation12 + $0x30] sm:$0xff] }
  0x7c   :  { %3114 = vmatpush3.bf16.msra.mxu0 %v3111_v18  ;;  %v395_v18 = vld [vmem:[#allocation12 + $0x8] sm:$0xff]  ;;  %v394_v21 = vld [vmem:[#allocation12] sm:$0xff]  ;;  %v396_v30 = vld [vmem:[#allocation12 + $0x10] sm:$0xff] }
  0x7d   :  { %3116 = vmatprep.subr.bf16.mxu0 %v3115_v24  ;;  %v3159_v20 = vpack.c.bf16 %v398_v19, %v395_v18  ;;  %v3161_v23 = vpack.c.bf16 %v397_v22, %v394_v21  ;;  %v403_v29 = vld [vmem:[#allocation12 + $0x48] sm:$0xff]  ;;  %v410_v35 = vld [vmem:[#allocation12 + $0x80] sm:$0xff]  ;;  %v405_v40 = vld [vmem:[#allocation12 + $0x58] sm:$0xff] }
  0x7e   :  { %3146 = vmatpush3.bf16.msra.mxu1 %v3145_v25  ;;  %v404_v25 = vld [vmem:[#allocation12 + $0x50] sm:$0xff]  ;;  %v407_v34 = vld [vmem:[#allocation12 + $0x68] sm:$0xff]  ;;  %v406_v36 = vld [vmem:[#allocation12 + $0x60] sm:$0xff] }
  0x7f   :  { %3147 = vmatprep.subr.bf16.mxu1 %v3946_v0  ;;  %v402_v39 = vld [vmem:[#allocation12 + $0x40] sm:$0xff]  ;;  %v413_v42 = vld [vmem:[#allocation12 + $0x98] sm:$0xff]  ;;  %v411_v45 = vld [vmem:[#allocation12 + $0x88] sm:$0xff] }
  0x80   :  { %3118 = vmatpush3.bf16.msra.mxu0 %v3115_v24  ;;  %v401_v24 = vld [vmem:[#allocation12 + $0x38] sm:$0xff]  ;;  %v3195_v41 = vpack.c.bf16 %v405_v40, %v402_v39  ;;  %v412_v47 = vld [vmem:[#allocation12 + $0x90] sm:$0xff]  ;;  %v414_v53 = vld [vmem:[#allocation12 + $0xa0] sm:$0xff] }
  0x81   :  { %3120 = vmatprep.subr.bf16.mxu0 %v3119_v31  ;;  %v3163_v27 = vpack.c.bf16 %v404_v25, %v401_v24  ;;  %v417_v54 = vld [vmem:[#allocation12 + $0xb8] sm:$0xff]  ;;  %v419_v55 = vld [vmem:[#allocation12 + $0xc8] sm:$0xff]  ;;  %v422_v56 = vld [vmem:[#allocation12 + $0xe0] sm:$0xff] }
  0x82   :  { %3149 = vmatpush3.bf16.msra.mxu1 %v3148_v32  ;;  %v3165_v32 = vpack.c.bf16 %v403_v29, %v400_v26  ;;  %v433_v19 = vld [vmem:[#allocation12 + $0x138] sm:$0xff]  ;;  %v435_v21 = vld [vmem:[#allocation12 + $0x148] sm:$0xff] }
  0x83   :  { %3150 = vmatprep.subr.bf16.mxu1 %v3946_v0  ;;  %v437_v22 = vld [vmem:[#allocation12 + $0x158] sm:$0xff]  ;;  %v439_v29 = vld [vmem:[#allocation12 + $0x168] sm:$0xff] }
  0x84   :  { %3122 = vmatpush3.bf16.msra.mxu0 %v3119_v31  ;;  %v399_v31 = vld [vmem:[#allocation12 + $0x28] sm:$0xff] }
  0x85   :  { %3124 = vmatprep.subr.bf16.mxu0 %v3123_v37  ;;  %v3191_v33 = vpack.c.bf16 %v399_v31, %v396_v30  ;;  %v773_v30 = vld [vmem:[#allocation13 + $0x8] sm:$0xff]  ;;  %v776_v31 = vld [vmem:[#allocation13 + $0x20] sm:$0xff] }
  0x86   :  { %3152 = vmatpush3.bf16.msra.mxu1 %v3151_v38  ;;  %v409_v38 = vld [vmem:[#allocation12 + $0x78] sm:$0xff] }
  0x87   :  { %3153 = vmatprep.subr.bf16.mxu1 %v3946_v0  ;;  %v3169_v46 = vpack.c.bf16 %v409_v38, %v406_v36 }
  0x88   :  { %3126 = vmatpush3.bf16.msra.mxu0 %v3123_v37  ;;  %v3167_v37 = vpack.c.bf16 %v410_v35, %v407_v34  ;;  %v438_v34 = vld [vmem:[#allocation12 + $0x160] sm:$0xff]  ;;  %v441_v35 = vld [vmem:[#allocation12 + $0x178] sm:$0xff] }
  0x89   :  { %3128 = vmatprep.subr.bf16.mxu0 %v3127_v43  ;;  %v3219_v36 = vpack.c.bf16 %v441_v35, %v438_v34  ;;  %v791_v34 = vld [vmem:[#allocation13 + $0x98] sm:$0xff] }
  0x8a   :  { %3155 = vmatpush3.bf16.msra.mxu1 %v3154_v44  ;;  %v408_v44 = vld [vmem:[#allocation12 + $0x70] sm:$0xff] }
  0x8b   :  { %3156 = vmatprep.subr.bf16.mxu1 %v3946_v0  ;;  %v3199_v48 = vpack.c.bf16 %v411_v45, %v408_v44 }
  0x8c   :  { %3130 = vmatpush3.bf16.msra.mxu0 %v3127_v43  ;;  %v416_v43 = vld [vmem:[#allocation12 + $0xb0] sm:$0xff] }
  0x8d   :  { %3132 = vmatprep.subr.bf16.mxu0 %v3131_v49 }
  0x8e   :  { %3158 = vmatpush3.bf16.msra.mxu1 %v3157_v50  ;;  %v415_v50 = vld [vmem:[#allocation12 + $0xa8] sm:$0xff] }
  0x8f   :  { %3192 = vmatprep.subr.bf16.mxu1 %v3191_v33 }
  0x90   :  { %3134 = vmatpush3.bf16.msra.mxu0 %v3131_v49  ;;  %v3171_v49 = vpack.c.bf16 %v416_v43, %v413_v42 }
  0x91   :  { %2786 = vmatmul.mubr.f32.vlgmr.msra.gmra.mrb[0].mxu1 %v4107_v51  ;;  %3160 = vmatprep.subr.bf16.mxu0 %v3159_v20  ;;  %v432_v20 = vld [vmem:[#allocation12 + $0x130] sm:$0xff] }
  0x92   :  { %3194 = vmatpush3.bf16.msra.mxu1 %v3191_v33  ;;  %v3215_v25 = vpack.c.bf16 %v435_v21, %v432_v20  ;;  %v4128_v33 = vpack.c.bf16 %v776_v31, %v773_v30  ;;  %v778_v20 = vld [vmem:[#allocation13 + $0x30] sm:$0xff]  ;;  %v781_v21 = vld [vmem:[#allocation13 + $0x48] sm:$0xff]  ;;  %v784_v31 = vld [vmem:[#allocation13 + $0x60] sm:$0xff] }
  0x93   :  { %2751 = vmatmul.mubr.f32.vlgmr.msra.gmra.mrb[0].mxu0 %v4109_v52  ;;  %3196 = vmatprep.subr.bf16.mxu1 %v3195_v41 }
  0x94   :  { %523 = vmatprep.mubr.f32.mxu0 %v3948_v1  ;;  %3162 = vmatpush1.bf16.msra.mxu0 %v3161_v23  ;;  %v440_v23 = vld [vmem:[#allocation12 + $0x170] sm:$0xff] }
  0x95   :  { %3164 = vmatprep.subr.bf16.mxu0 %v3163_v27  ;;  %v3187_v26 = vpack.c.bf16 %v440_v23, %v437_v22  ;;  %v436_v27 = vld [vmem:[#allocation12 + $0x150] sm:$0xff]  ;;  %v785_v22 = vld [vmem:[#allocation13 + $0x68] sm:$0xff] }
  0x96   :  { %3198 = vmatpush3.bf16.msra.mxu1 %v3195_v41 }
  0x97   :  { %3200 = vmatprep.subr.bf16.mxu1 %v3199_v48 }
  0x98   :  { %3166 = vmatpush1.bf16.msra.mxu0 %v3165_v32  ;;  %v3189_v32 = vpack.c.bf16 %v439_v29, %v436_v27  ;;  %v4139_v29 = vpack.c.bf16 %v781_v21, %v778_v20  ;;  %v814_v20 = vld [vmem:[#allocation13 + $0x150] sm:$0xff]  ;;  %v817_v21 = vld [vmem:[#allocation13 + $0x168] sm:$0xff] }
  0x99   :  { %3168 = vmatprep.subr.bf16.mxu0 %v3167_v37 }
  0x9a   :  { %3202 = vmatpush3.bf16.msra.mxu1 %v3199_v48 }
  0x9c   :  { %3170 = vmatpush1.bf16.msra.mxu0 %v3169_v46 }
  0x9d   :  { %3172 = vmatprep.subr.bf16.mxu0 %v3171_v49 }
 0x164   :  { %v295_v59 = vpop.f32.mrb[0].mxu1 }
 0x165   :  { %v306_v60 = vrot.slane %v295_v59, %v305_v58  ;;  %v2787_v61 = vpop.f32.mrb[1].mxu1  ;;  %v418_v59 = vld [vmem:[#allocation12 + $0xc0] sm:$0xff] }
 0x166   :  { %v2752_v63 = vpop.f32.mrb[0].mxu0  ;;  %v3175_v61 = vpack.c.bf16 %v422_v56, %v419_v55 }
 0x167   :  { %v307_v2 = vcombine.high %v306_v60, %v306_v60  ;;  %v314_v3 = vrot.slane %v306_v60, %v305_v58  ;;  %v204_v4 = vpop.f32.mrb[1].mxu0  ;;  %v3203_v60 = vpack.c.bf16 %v417_v54, %v414_v53 }
 0x169   :  { %v321_v5 = vrot.slane %v307_v2, %v305_v58  ;;  %v325_v6 = vrot.slane %v314_v3, %v4118_v62  ;;  %v3173_v58 = vpack.c.bf16 %v415_v50, %v412_v47  ;;  %v420_v2 = vld [vmem:[#allocation12 + $0xd0] sm:$0xff]  ;;  %v423_v3 = vld [vmem:[#allocation12 + $0xe8] sm:$0xff]  ;;  %3204 = vmatprep.subr.bf16.mxu1 %v3203_v60 }
 0x16a   :  { %3206 = vmatpush3.bf16.msra.mxu1 %v3203_v60 }
 0x16b   :  { %v329_v8 = vrot.slane %v321_v5, %v4118_v62  ;;  %v332_v9 = vadd.f32 %v325_v6, %v204_v4  ;;  %v425_v4 = vld [vmem:[#allocation12 + $0xf8] sm:$0xff]  ;;  %v428_v5 = vld [vmem:[#allocation12 + $0x110] sm:$0xff]  ;;  %3174 = vmatpush1.bf16.msra.mxu0 %v3173_v58 }
 0x16c   :  { %3176 = vmatprep.subr.bf16.mxu0 %v3175_v61 }
 0x16d   :  { %v333_v10 = vadd.f32 %v2752_v63, %v329_v8  ;;  %v341_v11 = vadd.f32 %v2495_v7, %v332_v9  ;;  %v421_v63 = vld [vmem:[#allocation12 + $0xd8] sm:$0xff]  ;;  %v3207_v8 = vpack.c.bf16 %v423_v3, %v420_v2  ;;  %v3179_v9 = vpack.c.bf16 %v428_v5, %v425_v4 }
 0x16e   :  { %v3177_v6 = vpack.c.bf16 %v421_v63, %v418_v59 }
 0x16f   :  { %v342_v12 = vadd.f32 %v2495_v7, %v333_v10  ;;  %3688 = vtanh.f32 %v341_v11  ;;  %v424_v7 = vld [vmem:[#allocation12 + $0xf0] sm:$0xff]  ;;  %v427_v10 = vld [vmem:[#allocation12 + $0x108] sm:$0xff]  ;;  %v426_v11 = vld [vmem:[#allocation12 + $0x100] sm:$0xff]  ;;  %3208 = vmatprep.subr.bf16.mxu1 %v3207_v8 }
 0x170   :  { %3178 = vmatpush1.bf16.msra.mxu0 %v3177_v6  ;;  %3210 = vmatpush3.bf16.msra.mxu1 %v3207_v8 }
 0x171   :  { %3690 = vtanh.f32 %v342_v12  ;;  %v429_v12 = vld [vmem:[#allocation12 + $0x118] sm:$0xff]  ;;  %3180 = vmatprep.subr.bf16.mxu0 %v3179_v9 }
 0x179   :  { %v3689_v14 = vpop.eup %3688 }
 0x17a   :  { %v352_v15 = vmul.f32 %v3689_v14, %v2496_v13  ;;  %v434_v14 = vld [vmem:[#allocation12 + $0x140] sm:$0xff] }
 0x17b   :  { %v3691_v16 = vpop.eup %3690 }
 0x17c   :  { %354 = vadd.xlane.f32.xlu0 %v352_v15  ;;  %v353_v17 = vmul.f32 %v3691_v16, %v2496_v13  ;;  %v431_v13 = vld [vmem:[#allocation12 + $0x128] sm:$0xff]  ;;  %v3181_v15 = vpack.c.bf16 %v427_v10, %v424_v7  ;;  %v430_v16 = vld [vmem:[#allocation12 + $0x120] sm:$0xff] }
 0x17d   :  { %v3183_v18 = vpack.c.bf16 %v434_v14, %v431_v13  ;;  %v3185_v24 = vpack.c.bf16 %v433_v19, %v430_v16  ;;  %v779_v14 = vld [vmem:[#allocation13 + $0x38] sm:$0xff] }
 0x17e   :  { %3182 = vmatpush1.bf16.msra.mxu0 %v3181_v15  ;;  %v782_v15 = vld [vmem:[#allocation13 + $0x50] sm:$0xff] }
 0x17f   :  { %3184 = vmatprep.subr.bf16.mxu0 %v3183_v18  ;;  %v4135_v19 = vpack.c.bf16 %v782_v15, %v779_v14  ;;  %v804_v14 = vld [vmem:[#allocation13 + $0x100] sm:$0xff]  ;;  %v807_v15 = vld [vmem:[#allocation13 + $0x118] sm:$0xff] }
 0x180   :  { %356 = vadd.xlane.f32.xlu0 %v353_v17  ;;  %v3211_v17 = vpack.c.bf16 %v429_v12, %v426_v11  ;;  %v772_v11 = vld [vmem:[#allocation13] sm:$0xff]  ;;  %v775_v12 = vld [vmem:[#allocation13 + $0x18] sm:$0xff] }
 0x182   :  { %3212 = vmatprep.subr.bf16.mxu1 %v3211_v17  ;;  %3186 = vmatpush1.bf16.msra.mxu0 %v3185_v24  ;;  %v788_v24 = vld [vmem:[#allocation13 + $0x80] sm:$0xff] }
 0x183   :  { %3214 = vmatpush3.bf16.msra.mxu1 %v3211_v17  ;;  %3188 = vmatprep.subr.bf16.mxu0 %v3187_v26  ;;  %v4132_v17 = vpack.c.bf16 %v775_v12, %v772_v11  ;;  %v777_v26 = vld [vmem:[#allocation13 + $0x28] sm:$0xff]  ;;  %v4143_v30 = vpack.c.bf16 %v788_v24, %v785_v22  ;;  %v815_v11 = vld [vmem:[#allocation13 + $0x158] sm:$0xff]  ;;  %v4197_v22 = vpack.c.bf16 %v807_v15, %v804_v14 }
 0x184   :  { %3216 = vmatprep.subr.bf16.mxu1 %v3215_v25  ;;  %v813_v24 = vld [vmem:[#allocation13 + $0x148] sm:$0xff] }
 0x186   :  { %3190 = vmatpush1.bf16.msra.mxu0 %v3189_v32  ;;  %v787_v32 = vld [vmem:[#allocation13 + $0x78] sm:$0xff] }
 0x187   :  { %3218 = vmatpush3.bf16.msra.mxu1 %v3215_v25  ;;  %3224 = vmatprep.subr.bf16.mxu0 %v4128_v33  ;;  %v774_v25 = vld [vmem:[#allocation13 + $0x10] sm:$0xff] }
 0x188   :  { %3220 = vmatprep.subr.bf16.mxu1 %v3219_v36  ;;  %v4145_v35 = vpack.c.bf16 %v777_v26, %v774_v25  ;;  %v4201_v25 = vpack.c.bf16 %v817_v21, %v814_v20 }
 0x18b   :  { %3222 = vmatpush3.bf16.msra.mxu1 %v3219_v36  ;;  %v794_v36 = vld [vmem:[#allocation13 + $0xb0] sm:$0xff] }
 0x18c   :  { %3255 = vmatprep.subr.bf16.mxu1 %v3946_v0 }
 0x209   :  { %v355_v37 = vpop.xlane.xlu0 %354 }
 0x20a   :  { %v358_v38 = vrot.slane %v355_v37, 4 }
 0x20c   :  { %v359_v39 = vmax.f32 %v355_v37, %v358_v38  ;;  %v783_v38 = vld [vmem:[#allocation13 + $0x58] sm:$0xff] }
 0x20d   :  { %v357_v40 = vpop.xlane.xlu0 %356 }
 0x20e   :  { %v360_v41 = vrot.slane %v359_v39, 2  ;;  %v364_v42 = vrot.slane %v357_v40, 4 }
 0x210   :  { %v361_v43 = vmax.f32 %v359_v39, %v360_v41  ;;  %v365_v44 = vmax.f32 %v357_v40, %v364_v42  ;;  %v4148_v39 = vpack.c.bf16 %v787_v32, %v784_v31  ;;  %v793_v41 = vld [vmem:[#allocation13 + $0xa8] sm:$0xff] }
 0x211   :  { %v797_v42 = vld [vmem:[#allocation13 + $0xc8] sm:$0xff] }
 0x212   :  { %v362_v45 = vrot.slane %v361_v43, 1  ;;  %v366_v46 = vrot.slane %v365_v44, 2  ;;  %v442_v32 = vld [vmem:[%s4632_s8] sm:$0x7] }
 0x214   :  { %v363_v47 = vmax.f32 %v361_v43, %v362_v45  ;;  %v367_v48 = vmax.f32 %v365_v44, %v366_v46  ;;  %v800_v44 = vld [vmem:[#allocation13 + $0xe0] sm:$0xff]  ;;  %v786_v45 = vld [vmem:[#allocation13 + $0x70] sm:$0xff]  ;;  %v789_v46 = vld [vmem:[#allocation13 + $0x88] sm:$0xff] }
 0x216   :  { %v370_v49 = vsub.f32 %v355_v37, %v363_v47  ;;  %v368_v50 = vrot.slane %v367_v48, 1  ;;  %v780_v37 = vld [vmem:[#allocation13 + $0x40] sm:$0xff] }
 0x217   :  { %v4155_v43 = vpack.c.bf16 %v783_v38, %v780_v37  ;;  %v447_v38 = vrot.slane %v442_v32, %v4118_v62 }
 0x218   :  { %v372_v53 = vmul.f32 1.442695, %v370_v49  ;;  %v369_v54 = vmax.f32 %v367_v48, %v368_v50  ;;  %v4164_v48 = vpack.c.bf16 %v800_v44, %v797_v42  ;;  %v796_v49 = vld [vmem:[#allocation13 + $0xc0] sm:$0xff]  ;;  %v799_v50 = vld [vmem:[#allocation13 + $0xd8] sm:$0xff] }
 0x21a   :  { %3692 = vpow2.f32 %v372_v53  ;;  %v371_v55 = vsub.f32 %v357_v40, %v369_v54  ;;  %v790_v40 = vld [vmem:[#allocation13 + $0x90] sm:$0xff]  ;;  %v803_v53 = vld [vmem:[#allocation13 + $0xf8] sm:$0xff]  ;;  %v4167_v54 = vpack.c.bf16 %v789_v46, %v786_v45 }
 0x21b   :  { %v4161_v47 = vpack.c.bf16 %v793_v41, %v790_v40  ;;  %v454_v40 = vsub.s32 2, %v4114_v57 }
 0x21c   :  { %v374_v56 = vmul.f32 1.442695, %v371_v55  ;;  %v806_v55 = vld [vmem:[#allocation13 + $0x110] sm:$0xff] }
 0x21e   :  { %3694 = vpow2.f32 %v374_v56  ;;  %v792_v56 = vld [vmem:[#allocation13 + $0xa0] sm:$0xff] }
 0x224   :  { %v3693_v58 = vpop.eup %3692 }
 0x225   :  { %v376_v59 = vrot.slane %v3693_v58, 4 }
 0x227   :  { %v377_v60 = vadd.f32 %v3693_v58, %v376_v59  ;;  %v4171_v59 = vpack.c.bf16 %v799_v50, %v796_v49  ;;  %v455_v49 = vrot.slane %v442_v32, %v454_v40 }
 0x228   :  { %v3695_v61 = vpop.eup %3694 }
 0x229   :  { %v378_v63 = vrot.slane %v377_v60, 2  ;;  %v382_v2 = vrot.slane %v3695_v61, 4 }
 0x22b   :  { %v379_v3 = vadd.f32 %v378_v63, %v377_v60  ;;  %v383_v4 = vadd.f32 %v3695_v61, %v382_v2  ;;  %v4174_v60 = vpack.c.bf16 %v806_v55, %v803_v53  ;;  %v805_v63 = vld [vmem:[#allocation13 + $0x108] sm:$0xff] }
 0x22c   :  { %v809_v2 = vld [vmem:[#allocation13 + $0x128] sm:$0xff] }
 0x22d   :  { %v380_v5 = vrot.slane %v379_v3, 1  ;;  %v384_v6 = vrot.slane %v383_v4, 2 }
 0x22f   :  { %v381_v7 = vadd.f32 %v380_v5, %v379_v3  ;;  %v385_v8 = vadd.f32 %v384_v6, %v383_v4  ;;  %v812_v4 = vld [vmem:[#allocation13 + $0x140] sm:$0xff]  ;;  %v798_v5 = vld [vmem:[#allocation13 + $0xd0] sm:$0xff]  ;;  %v801_v6 = vld [vmem:[#allocation13 + $0xe8] sm:$0xff] }
 0x230   :  { %v4187_v12 = vpack.c.bf16 %v801_v6, %v798_v5 }
 0x231   :  { %3696 = vrcp.f32 %v381_v7  ;;  %v386_v9 = vrot.slane %v385_v8, 1 }
 0x233   :  { %v387_v10 = vadd.f32 %v386_v9, %v385_v8  ;;  %v4184_v8 = vpack.c.bf16 %v812_v4, %v809_v2  ;;  %v808_v9 = vld [vmem:[#allocation13 + $0x120] sm:$0xff] }
 0x235   :  { %3698 = vrcp.f32 %v387_v10  ;;  %v811_v10 = vld [vmem:[#allocation13 + $0x138] sm:$0xff] }
 0x23b   :  { %v3697_v13 = vpop.eup %3696 }
 0x23c   :  { %v389_v16 = vmul.f32 %v3697_v13, %v3693_v58  ;;  %v795_v58 = vld [vmem:[#allocation13 + $0xb8] sm:$0xff]  ;;  %v818_v13 = vld [vmem:[#allocation13 + $0x170] sm:$0xff] }
 0x23d   :  { %v4177_v3 = vpack.c.bf16 %v795_v58, %v792_v56 }
 0x23e   :  { %v392_v18 = vmul.f32 %v389_v16, %v4099_v28  ;;  %v4191_v16 = vpack.c.bf16 %v811_v10, %v808_v9 }
 0x23f   :  { %v3699_v23 = vpop.eup %3698 }
 0x240   :  { %524 = vmatmul.mubr.f32.vlgmr.msra.gmra.mrb[2].mxu0 %v392_v18  ;;  %2820 = vmatprep.mubr.f32.mxu1 %v392_v18  ;;  %v391_v27 = vmul.f32 %v3699_v23, %v3695_v61  ;;  %v802_v61 = vld [vmem:[#allocation13 + $0xf0] sm:$0xff]  ;;  %v4194_v18 = vpack.c.bf16 %v818_v13, %v815_v11 }
 0x241   :  { %3226 = vmatpush1.bf16.msra.mxu0 %v4132_v17  ;;  %529 = vmatprep.mubr.f32.mxu0 %v3948_v1  ;;  %v4181_v7 = vpack.c.bf16 %v805_v63, %v802_v61  ;;  %v810_v23 = vld [vmem:[#allocation13 + $0x130] sm:$0xff] }
 0x242   :  { %3228 = vmatprep.subr.bf16.mxu0 %v4135_v19  ;;  %v393_v28 = vmul.f32 %v391_v27, %v4109_v52  ;;  %v4152_v52 = vpack.c.bf16 %v794_v36, %v791_v34  ;;  %v4205_v26 = vpack.c.bf16 %v813_v24, %v810_v23  ;;  %v816_v27 = vld [vmem:[#allocation13 + $0x160] sm:$0xff]  ;;  %v450_v34 = vsub.s32 1, %v4114_v57 }
 0x243   :  { %v3950_v36 = vmov 1983009808  }
 0x244   :  { %530 = vmatmul.mubr.f32.gmra.mrb[4].mxu0 %v393_v28  ;;  %2821 = vmatmul.mubr.f32.vlgmr.msra.gmra.mrb[2].mxu1 %v393_v28  ;;  %v819_v28 = vld [vmem:[#allocation13 + $0x178] sm:$0xff]  ;;  %v619_v37 = vunpack.c.l.s4 %v3950_v36  ;;  %v451_v41 = vrot.slane %v442_v32, %v450_v34 }
 0x245   :  { %3230 = vmatpush1.bf16.msra.mxu0 %v4139_v29  ;;  %902 = vmatprep.mubr.f32.mxu0 %v3948_v1  ;;  %v4210_v31 = vpack.c.bf16 %v819_v28, %v816_v27 }
 0x246   :  { %3232 = vmatprep.subr.bf16.mxu0 %v4143_v30  ;;  %3257 = vmatpush3.bf16.msra.mxu1 %v4145_v35  ;;  %v620_v42 = vunpack.c.0.s8 %v619_v37 }
 0x247   :  { %3258 = vmatprep.subr.bf16.mxu1 %v3946_v0  ;;  %2855 = vmatprep.mubr.msk.f32.mxu1 %vm3947_vm0, %v3948_v1 }
 0x248   :  { %v4264_v53 = vsub.s32 %v620_v42, %v4114_v57 }
 0x249   :  { %3234 = vmatpush1.bf16.msra.mxu0 %v4148_v39 }
 0x24a   :  { %3236 = vmatprep.subr.bf16.mxu0 %v4152_v52  ;;  %3260 = vmatpush3.bf16.msra.mxu1 %v4155_v43 }
 0x24b   :  { %3261 = vmatprep.subr.bf16.mxu1 %v3946_v0 }
 0x24d   :  { %3238 = vmatpush1.bf16.msra.mxu0 %v4161_v47 }
 0x24e   :  { %3240 = vmatprep.subr.bf16.mxu0 %v4164_v48  ;;  %3263 = vmatpush3.bf16.msra.mxu1 %v4167_v54 }
 0x24f   :  { %3264 = vmatprep.subr.bf16.mxu1 %v3946_v0 }
 0x251   :  { %3242 = vmatpush1.bf16.msra.mxu0 %v4171_v59 }
 0x252   :  { %3244 = vmatprep.subr.bf16.mxu0 %v4174_v60  ;;  %3266 = vmatpush3.bf16.msra.mxu1 %v4177_v3 }
 0x253   :  { %3267 = vmatprep.subr.bf16.mxu1 %v3946_v0 }
 0x255   :  { %3246 = vmatpush1.bf16.msra.mxu0 %v4181_v7 }
 0x256   :  { %3248 = vmatprep.subr.bf16.mxu0 %v4184_v8  ;;  %3269 = vmatpush3.bf16.msra.mxu1 %v4187_v12 }
 0x257   :  { %3270 = vmatprep.subr.bf16.mxu1 %v3946_v0 }
 0x259   :  { %3250 = vmatpush1.bf16.msra.mxu0 %v4191_v16 }
 0x25a   :  { %3252 = vmatprep.subr.bf16.mxu0 %v4194_v18  ;;  %3272 = vmatpush3.bf16.msra.mxu1 %v4197_v22 }
 0x25b   :  { %3273 = vmatprep.subr.bf16.mxu1 %v3946_v0 }
 0x25d   :  { %3254 = vmatpush1.bf16.msra.mxu0 %v4201_v25 }
 0x25e   :  { %3275 = vmatpush3.bf16.msra.mxu1 %v4205_v26  ;;  %3280 = vmatprep.subr.bf16.mxu0 %v4128_v33 }
 0x25f   :  { %3276 = vmatprep.subr.bf16.mxu1 %v3946_v0 }
 0x260   :  { %903 = vmatmul.mubr.f32.vlgmr.msra.gmra.mrb[6].mxu0 %v4107_v51 }
 0x261   :  { %3282 = vmatpush1.bf16.msra.mxu0 %v4132_v17  ;;  %1076 = vmatprep.mubr.f32.mxu0 %v3948_v1 }
 0x262   :  { %3278 = vmatpush3.bf16.msra.mxu1 %v4210_v31  ;;  %3284 = vmatprep.subr.bf16.mxu0 %v4135_v19 }
 0x263   :  { %3311 = vmatprep.subr.bf16.mxu1 %v3946_v0 }
 0x265   :  { %2856 = vmatmul.mubr.f32.vlgmr.msra.gmra.mrb[4].mxu1 %v4107_v51  ;;  %3286 = vmatpush1.bf16.msra.mxu0 %v4139_v29 }
 0x266   :  { %3313 = vmatpush3.bf16.msra.mxu1 %v4145_v35  ;;  %3288 = vmatprep.subr.bf16.mxu0 %v4143_v30 }
 0x267   :  { %3314 = vmatprep.subr.bf16.mxu1 %v3946_v0  ;;  %2890 = vmatprep.mubr.msk.f32.mxu1 %vm3947_vm0, %v3948_v1 }
 0x269   :  { %3290 = vmatpush1.bf16.msra.mxu0 %v4148_v39 }
 0x26a   :  { %3316 = vmatpush3.bf16.msra.mxu1 %v4155_v43  ;;  %3292 = vmatprep.subr.bf16.mxu0 %v4152_v52 }
 0x26b   :  { %3317 = vmatprep.subr.bf16.mxu1 %v3946_v0 }
 0x26d   :  { %3294 = vmatpush1.bf16.msra.mxu0 %v4161_v47 }
 0x26e   :  { %3319 = vmatpush3.bf16.msra.mxu1 %v4167_v54  ;;  %3296 = vmatprep.subr.bf16.mxu0 %v4164_v48 }
 0x26f   :  { %3320 = vmatprep.subr.bf16.mxu1 %v3946_v0 }
 0x271   :  { %3298 = vmatpush1.bf16.msra.mxu0 %v4171_v59 }
 0x272   :  { %3322 = vmatpush3.bf16.msra.mxu1 %v4177_v3  ;;  %3300 = vmatprep.subr.bf16.mxu0 %v4174_v60 }
 0x273   :  { %3323 = vmatprep.subr.bf16.mxu1 %v3946_v0 }
 0x275   :  { %3302 = vmatpush1.bf16.msra.mxu0 %v4181_v7 }
 0x276   :  { %3325 = vmatpush3.bf16.msra.mxu1 %v4187_v12  ;;  %3304 = vmatprep.subr.bf16.mxu0 %v4184_v8 }
 0x277   :  { %3326 = vmatprep.subr.bf16.mxu1 %v3946_v0 }
 0x279   :  { %3306 = vmatpush1.bf16.msra.mxu0 %v4191_v16 }
 0x27a   :  { %3328 = vmatpush3.bf16.msra.mxu1 %v4197_v22  ;;  %3308 = vmatprep.subr.bf16.mxu0 %v4194_v18 }
 0x27b   :  { %3329 = vmatprep.subr.bf16.mxu1 %v3946_v0 }
 0x27d   :  { %3310 = vmatpush1.bf16.msra.mxu0 %v4201_v25 }
 0x27e   :  { %3331 = vmatpush3.bf16.msra.mxu1 %v4205_v26  ;;  %3336 = vmatprep.subr.bf16.mxu0 %v4128_v33 }
 0x27f   :  { %3332 = vmatprep.subr.bf16.mxu1 %v3946_v0 }
 0x282   :  { %3334 = vmatpush3.bf16.msra.mxu1 %v4210_v31 }
 0x283   :  { %3367 = vmatprep.subr.bf16.mxu1 %v3946_v0 }
 0x313   :  { %v525_v44 = vpop.f32.mrb[2].mxu0 }
 0x314   :  { %v526_v45 = vadd.f32 %v525_v44, %v447_v38  ;;  %v527_v46 = vpop.f32.mrb[3].mxu0 }
 0x315   :  { %v528_v50 = vadd.f32 %v527_v46, %v451_v41 }
 0x317   :  { %v617_v55 = vcombine.low %v526_v45, %v528_v50  ;;  %v696_v56 = vcombine.high %v526_v45, %v528_v50  ;;  %v531_v58 = vpop.f32.mrb[4].mxu0  ;;  %v2822_v61 = vpop.f32.mrb[2].mxu1 }
 0x318   :  { %v532_v63 = vadd.f32 %v531_v58, %v447_v38  ;;  %v608_v2 = vadd.f32 %v2822_v61, %v455_v49  ;;  %v533_v4 = vpop.f32.mrb[5].mxu0  ;;  %v602_v5 = vpop.f32.mrb[3].mxu1 }
 0x319   :  { %v534_v6 = vadd.f32 %v533_v4, %v451_v41  ;;  %v603_v9 = vadd.f32 %v602_v5, %v455_v49  ;;  %v624_v10 = vrot.slane %v617_v55, %v4264_v53  ;;  %v704_v36 = vrot.slane %v696_v56, %v4264_v53 }
 0x31a   :  { %v714_v11 = vcombine.high %v608_v2, %v608_v2  ;;  %v647_v21 = vrot.slane %v608_v2, %v4264_v53 }
 0x31b   :  { %v633_v13 = vcombine.low %v532_v63, %v534_v6  ;;  %v713_v14 = vcombine.high %v532_v63, %v534_v6  ;;  %v631_v15 = vrot.slane %v603_v9, %v4264_v53  ;;  %v697_v20 = vcombine.high %v603_v9, %v603_v9 }
 0x31c   :  { %v728_v23 = vrot.slane %v714_v11, %v4264_v53 }
 0x31d   :  { %v640_v24 = vrot.slane %v633_v13, %v4264_v53  ;;  %v721_v27 = vrot.slane %v713_v14, %v4264_v53  ;;  %v632_v28 = vcombine.low %v624_v10, %v631_v15  ;;  %v674_v32 = vcombine.high %v624_v10, %v631_v15 }
 0x31e   :  { %v711_v37 = vrot.slane %v697_v20, %v4264_v53 }
 0x31f   :  { %v648_v38 = vcombine.low %v640_v24, %v647_v21  ;;  %v675_v41 = vcombine.high %v640_v24, %v647_v21  ;;  %v729_v42 = vcombine.low %v721_v27, %v728_v23  ;;  %v751_v44 = vcombine.high %v721_v27, %v728_v23 }
 0x320   :  { %v664_v45 = vrot.slane %v632_v28, 1  ;;  %v686_v46 = vrot.slane %v674_v32, 1  ;;  %v712_v49 = vcombine.low %v704_v36, %v711_v37  ;;  %v750_v50 = vcombine.high %v704_v36, %v711_v37 }
 0x321   :  { %v653_v55 = vrot.slane %v648_v38, 7  ;;  %v678_v58 = vrot.slane %v675_v41, 7  ;;  %v732_v61 = vrot.slane %v729_v42, 7  ;;  %v754_v63 = vrot.slane %v751_v44, 7 }
 0x322   :  { %v667_v2 = vsel %vm654_vm1, %v648_v38, %v664_v45  ;;  %v689_v56 = vsel %vm654_vm1, %v675_v41, %v686_v46  ;;  %v740_v4 = vrot.slane %v712_v49, 1  ;;  %v762_v5 = vrot.slane %v750_v50, 1 }
 0x323   :  { %v655_v6 = vsel %vm654_vm1, %v653_v55, %v632_v28  ;;  %v668_v9 = vsel %vm656_vm2, %v648_v38, %v667_v2  ;;  %v679_v10 = vsel %vm654_vm1, %v678_v58, %v674_v32  ;;  %v690_v11 = vsel %vm656_vm2, %v675_v41, %v689_v56 }
 0x324   :  { %v657_v13 = vsel %vm656_vm2, %v653_v55, %v655_v6  ;;  %v669_v14 = vsel %vm658_vm3, %v648_v38, %v668_v9  ;;  %v680_v15 = vsel %vm656_vm2, %v678_v58, %v679_v10  ;;  %v691_v20 = vsel %vm658_vm3, %v675_v41, %v690_v11  ;;  %v820_v10 = vld [vmem:[%s4633_s9] sm:$0x7]  ;;  %s3951_s9 = smov [#allocation16]  }
 0x325   :  { %v659_v21 = vsel %vm658_vm3, %v653_v55, %v657_v13  ;;  %v670_v23 = vsel %vm660_vm4, %v648_v38, %v669_v14  ;;  %v681_v24 = vsel %vm658_vm3, %v678_v58, %v680_v15  ;;  %v692_v27 = vsel %vm660_vm4, %v675_v41, %v691_v20  ;;  %s2479_s16 = sshll.u32 %s3951_s9, 4  ;;  %s2480_s16 = int_to_ptr.vmem [resolvable:$true] %s2479_s16 }
 0x326   :  { %v661_v28 = vsel %vm660_vm4, %v653_v55, %v659_v21  ;;  %673 = vst [vmem:[#allocation2 + $0x6] sm:$0x3f] %v670_v23  ;;  %v682_v32 = vsel %vm660_vm4, %v678_v58, %v681_v24  ;;  %695 = vst [vmem:[#allocation2 + $0x12] sm:$0x3f] %v692_v27  ;;  %v733_v36 = vsel %vm654_vm1, %v732_v61, %v712_v49  ;;  %s3880_s19 = scalar_lea.vmem %s2480_s16, 32  ;;  %p3885_p7 = scmp.lt.s32.totalorder %s2480_s16, %s2480_s16 }
 0x327   :  { %v743_v37 = vsel %vm654_vm1, %v729_v42, %v740_v4  ;;  %663 = vst [vmem:[#allocation2] sm:$0x3f] %v661_v28  ;;  %685 = vst [vmem:[#allocation2 + $0xc] sm:$0x3f] %v682_v32  ;;  %v734_v45 = vsel %vm656_vm2, %v732_v61, %v733_v36  ;;  %v755_v46 = vsel %vm654_vm1, %v754_v63, %v750_v50  ;;  %p3881_p6 = scmp.ne.s32.totalorder %s2480_s16, %s3880_s19  ;;  %p3886_p8 = scmp.lt.s32.totalorder %s3880_s19, %s3880_s19 }
 0x328   :  { %v744_v38 = vsel %vm656_vm2, %v729_v42, %v743_v37  ;;  %v765_v41 = vsel %vm654_vm1, %v751_v44, %v762_v5  ;;  %v735_v55 = vsel %vm658_vm3, %v732_v61, %v734_v45  ;;  %v756_v58 = vsel %vm656_vm2, %v754_v63, %v755_v46 }
 0x329   :  { %v745_v2 = vsel %vm658_vm3, %v729_v42, %v744_v38  ;;  %v766_v49 = vsel %vm656_vm2, %v751_v44, %v765_v41  ;;  %v736_v56 = vsel %vm660_vm4, %v732_v61, %v735_v55  ;;  %v757_v6 = vsel %vm658_vm3, %v754_v63, %v756_v58  ;;  %p3887_p9 = por %p3886_p8, %p3885_p7 }
 0x32a   :  { %v746_v4 = vsel %vm660_vm4, %v729_v42, %v745_v2  ;;  %v767_v9 = vsel %vm658_vm3, %v751_v44, %v766_v49  ;;  %739 = vst [vmem:[#allocation2 + $0x18] sm:$0x3f] %v736_v56  ;;  %v758_v50 = vsel %vm660_vm4, %v754_v63, %v757_v6  ;;  %v4310_v61 = vrot.slane %v820_v10, %v4118_v62 }
 0x32b   :  { %749 = vst [vmem:[#allocation2 + $0x1e] sm:$0x3f] %v746_v4  ;;  %v768_v5 = vsel %vm660_vm4, %v751_v44, %v767_v9  ;;  %761 = vst [vmem:[#allocation2 + $0x24] sm:$0x3f] %v758_v50  ;;  %v4314_v42 = vrot.slane %v820_v10, %v450_v34  ;;  %v4321_v34 = vrot.slane %v820_v10, %v454_v40  ;;  %p3888_p10 = pnand %p3887_p9, %p3881_p6 }
 0x32c   :  { %771 = vst [vmem:[#allocation2 + $0x2a] sm:$0x3f] %v768_v5 }
 0x32e   :  { %v821_v23 = vld [vmem:[#allocation2] sm:$0x3f] }
 0x32f   :  { %v999_v45 = vrot.slane %v821_v23, 4 }
 0x333   :  { %v904_v11 = vpop.f32.mrb[6].mxu0 }
 0x334   :  { %v905_v13 = vadd.f32 %v904_v11, %v4310_v61  ;;  %v906_v14 = vpop.f32.mrb[7].mxu0  ;;  %v1011_v11 = vld [vmem:[#allocation2 + $0x6] sm:$0x3f] }
 0x335   :  { %v907_v63 = vadd.f32 %v906_v14, %v4314_v42 }
 0x337   :  { %v981_v44 = vcombine.low %v905_v13, %v907_v63 }
 0x338   :  { %v975_v15 = vpop.f32.mrb[4].mxu1 }
 0x339   :  { %v988_v20 = vrot.slane %v981_v44, %v4264_v53  ;;  %v2857_v21 = vpop.f32.mrb[5].mxu1  ;;  %v976_v32 = vadd.f32 %v975_v15, %v4321_v34 }
 0x33b   :  { %v990_v24 = vadd.f32 %v988_v20, %v821_v23  ;;  %v1173_v23 = vrot.slane %v1011_v11, 4 }
 0x33d   :  { %v2497_v27 = vmul.f32 -1.442695, %v990_v24 }
 0x33f   :  { %3700 = vpow2.f32 %v2497_v27 }
 0x349   :  { %v3701_v62 = vpop.eup %3700 }
 0x34a   :  { %v994_v28 = vadd.f32 1.0, %v3701_v62 }
 0x34c   :  { %3702 = vrcp.f32 %v994_v28 }
 0x356   :  { %v3703_v36 = vpop.eup %3702 }
 0x357   :  { %v997_v37 = vmul.f32 %v3703_v36, %v976_v32  ;;  %v1004_v46 = vrot.slane %v3703_v36, 2 }
 0x359   :  { %v1001_v38 = vadd.f32 %v999_v45, %v997_v37  ;;  %v1006_v41 = vsub.f32 1.0, %v1004_v46  ;;  %v1008_v58 = vmul.f32 %v1004_v46, %v4107_v51 }
 0x35b   :  { %3704 = vtanh.f32 %v1001_v38 }
 0x365   :  { %v3705_v55 = vpop.eup %3704 }
 0x366   :  { %v1007_v2 = vmul.f32 %v3705_v55, %v1006_v41 }
 0x368   :  { %v4325_v49 = vadd.f32 %v1008_v58, %v1007_v2 }
 0x36a   :  { %1010 = vst [vmem:[#allocation3] sm:$0x3] %v4325_v49  ;;  %1077 = vmatmul.mubr.f32.vlgmr.msra.gmra.mrb[8].mxu0 %v4325_v49  ;;  %2891 = vmatmul.mubr.f32.vlgmr.msra.gmra.mrb[6].mxu1 %v4325_v49 }
 0x36b   :  { %3338 = vmatpush1.bf16.msra.mxu0 %v4132_v17  ;;  %3369 = vmatpush3.bf16.msra.mxu1 %v4145_v35 }
 0x36c   :  { %3340 = vmatprep.subr.bf16.mxu0 %v4135_v19  ;;  %3370 = vmatprep.subr.bf16.mxu1 %v3946_v0 }
 0x36d   :  { %1251 = vmatprep.mubr.f32.mxu0 %v3948_v1  ;;  %2925 = vmatprep.mubr.msk.f32.mxu1 %vm3947_vm0, %v3948_v1 }
 0x36f   :  { %3342 = vmatpush1.bf16.msra.mxu0 %v4139_v29  ;;  %3372 = vmatpush3.bf16.msra.mxu1 %v4155_v43 }
 0x370   :  { %3344 = vmatprep.subr.bf16.mxu0 %v4143_v30  ;;  %3373 = vmatprep.subr.bf16.mxu1 %v3946_v0 }
 0x371   :  { %v2505_v51 = vld.sshfl [vmem:[#allocation3] sm:$0x11 pattern:$0x75316420] }
 0x372   :  { %v2253_v57 = vcombine.high %v2505_v51, %v2505_v51  ;;  %2506 = vst.sshfl [vmem:[#allocation15] sm:$0x1 pattern:$0x73625140] %v2505_v51 }
 0x373   :  { %3346 = vmatpush1.bf16.msra.mxu0 %v4148_v39  ;;  %3375 = vmatpush3.bf16.msra.mxu1 %v4167_v54 }
 0x374   :  { %2507 = vst.sshfl [vmem:[#allocation15 + $0x8] sm:$0x1 pattern:$0x73625140] %v2253_v57  ;;  %3348 = vmatprep.subr.bf16.mxu0 %v4152_v52  ;;  %3376 = vmatprep.subr.bf16.mxu1 %v3946_v0 }
 0x377   :  { %3350 = vmatpush1.bf16.msra.mxu0 %v4161_v47  ;;  %3378 = vmatpush3.bf16.msra.mxu1 %v4177_v3 }
 0x378   :  { %3352 = vmatprep.subr.bf16.mxu0 %v4164_v48  ;;  %3379 = vmatprep.subr.bf16.mxu1 %v3946_v0 }
 0x37b   :  { %3354 = vmatpush1.bf16.msra.mxu0 %v4171_v59  ;;  %3381 = vmatpush3.bf16.msra.mxu1 %v4187_v12 }
 0x37c   :  { %3356 = vmatprep.subr.bf16.mxu0 %v4174_v60  ;;  %3382 = vmatprep.subr.bf16.mxu1 %v3946_v0 }
 0x37f   :  { %3358 = vmatpush1.bf16.msra.mxu0 %v4181_v7  ;;  %3384 = vmatpush3.bf16.msra.mxu1 %v4197_v22 }
 0x380   :  { %3360 = vmatprep.subr.bf16.mxu0 %v4184_v8  ;;  %3385 = vmatprep.subr.bf16.mxu1 %v3946_v0 }
 0x383   :  { %3362 = vmatpush1.bf16.msra.mxu0 %v4191_v16  ;;  %3387 = vmatpush3.bf16.msra.mxu1 %v4205_v26 }
 0x384   :  { %3364 = vmatprep.subr.bf16.mxu0 %v4194_v18  ;;  %3388 = vmatprep.subr.bf16.mxu1 %v3946_v0 }
 0x387   :  { %3366 = vmatpush1.bf16.msra.mxu0 %v4201_v25  ;;  %3390 = vmatpush3.bf16.msra.mxu1 %v4210_v31 }
 0x388   :  { %3392 = vmatprep.subr.bf16.mxu0 %v4128_v33  ;;  %3423 = vmatprep.subr.bf16.mxu1 %v3946_v0 }
 0x43d   :  { %v1078_v40 = vpop.f32.mrb[8].mxu0  ;;  %v1149_v56 = vpop.f32.mrb[6].mxu1 }
 0x43e   :  { %v1079_v4 = vadd.f32 %v1078_v40, %v4310_v61  ;;  %v1080_v6 = vpop.f32.mrb[9].mxu0  ;;  %v2892_v9 = vpop.f32.mrb[7].mxu1  ;;  %v1150_v15 = vadd.f32 %v1149_v56, %v4321_v34  ;;  %v1186_v40 = vld [vmem:[#allocation2 + $0xc] sm:$0x3f] }
 0x43f   :  { %v1081_v50 = vadd.f32 %v1080_v6, %v4314_v42 }
 0x441   :  { %v1155_v5 = vcombine.low %v1079_v4, %v1081_v50 }
 0x443   :  { %v1162_v10 = vrot.slane %v1155_v5, %v4264_v53 }
 0x445   :  { %v1164_v13 = vadd.f32 %v1162_v10, %v1011_v11  ;;  %v1348_v11 = vrot.slane %v1186_v40, 4 }
 0x447   :  { %v2498_v14 = vmul.f32 -1.442695, %v1164_v13 }
 0x449   :  { %3706 = vpow2.f32 %v2498_v14 }
 0x453   :  { %v3707_v63 = vpop.eup %3706 }
 0x454   :  { %v1168_v44 = vadd.f32 1.0, %v3707_v63 }
 0x456   :  { %3708 = vrcp.f32 %v1168_v44 }
 0x460   :  { %v3709_v20 = vpop.eup %3708 }
 0x461   :  { %v1171_v21 = vmul.f32 %v3709_v20, %v1150_v15  ;;  %v1178_v27 = vrot.slane %v3709_v20, 2 }
 0x463   :  { %v1175_v24 = vadd.f32 %v1173_v23, %v1171_v21  ;;  %v1180_v62 = vsub.f32 1.0, %v1178_v27  ;;  %v1182_v36 = vmul.f32 %v1178_v27, %v4325_v49 }
 0x465   :  { %3710 = vtanh.f32 %v1175_v24 }
 0x46f   :  { %v3711_v28 = vpop.eup %3710 }
 0x470   :  { %v1181_v32 = vmul.f32 %v3711_v28, %v1180_v62 }
 0x472   :  { %v4370_v37 = vadd.f32 %v1182_v36, %v1181_v32 }
 0x474   :  { %1185 = vst [vmem:[#allocation3 + $0x2] sm:$0x3] %v4370_v37  ;;  %1252 = vmatmul.mubr.f32.vlgmr.msra.gmra.mrb[10].mxu0 %v4370_v37  ;;  %2926 = vmatmul.mubr.f32.vlgmr.msra.gmra.mrb[8].mxu1 %v4370_v37 }
 0x475   :  { %3394 = vmatpush1.bf16.msra.mxu0 %v4132_v17  ;;  %3425 = vmatpush3.bf16.msra.mxu1 %v4145_v35 }
 0x476   :  { %3396 = vmatprep.subr.bf16.mxu0 %v4135_v19  ;;  %3426 = vmatprep.subr.bf16.mxu1 %v3946_v0 }
 0x477   :  { %1426 = vmatprep.mubr.f32.mxu0 %v3948_v1  ;;  %2960 = vmatprep.mubr.msk.f32.mxu1 %vm3947_vm0, %v3948_v1 }
 0x479   :  { %3398 = vmatpush1.bf16.msra.mxu0 %v4139_v29  ;;  %3428 = vmatpush3.bf16.msra.mxu1 %v4155_v43 }
 0x47a   :  { %3400 = vmatprep.subr.bf16.mxu0 %v4143_v30  ;;  %3429 = vmatprep.subr.bf16.mxu1 %v3946_v0 }
 0x47b   :  { %v2508_v45 = vld.sshfl [vmem:[#allocation3 + $0x2] sm:$0x11 pattern:$0x75316420] }
 0x47c   :  { %v2280_v38 = vcombine.high %v2508_v45, %v2508_v45  ;;  %2509 = vst.sshfl [vmem:[#allocation15 + $0x1] sm:$0x1 pattern:$0x73625140] %v2508_v45 }
 0x47d   :  { %3402 = vmatpush1.bf16.msra.mxu0 %v4148_v39  ;;  %3431 = vmatpush3.bf16.msra.mxu1 %v4167_v54 }
 0x47e   :  { %2510 = vst.sshfl [vmem:[#allocation15 + $0x9] sm:$0x1 pattern:$0x73625140] %v2280_v38  ;;  %3404 = vmatprep.subr.bf16.mxu0 %v4152_v52  ;;  %3432 = vmatprep.subr.bf16.mxu1 %v3946_v0 }
 0x481   :  { %3406 = vmatpush1.bf16.msra.mxu0 %v4161_v47  ;;  %3434 = vmatpush3.bf16.msra.mxu1 %v4177_v3 }
 0x482   :  { %3408 = vmatprep.subr.bf16.mxu0 %v4164_v48  ;;  %3435 = vmatprep.subr.bf16.mxu1 %v3946_v0 }
 0x485   :  { %3410 = vmatpush1.bf16.msra.mxu0 %v4171_v59  ;;  %3437 = vmatpush3.bf16.msra.mxu1 %v4187_v12 }
 0x486   :  { %3412 = vmatprep.subr.bf16.mxu0 %v4174_v60  ;;  %3438 = vmatprep.subr.bf16.mxu1 %v3946_v0 }
 0x489   :  { %3414 = vmatpush1.bf16.msra.mxu0 %v4181_v7  ;;  %3440 = vmatpush3.bf16.msra.mxu1 %v4197_v22 }
 0x48a   :  { %3416 = vmatprep.subr.bf16.mxu0 %v4184_v8  ;;  %3441 = vmatprep.subr.bf16.mxu1 %v3946_v0 }
 0x48d   :  { %3418 = vmatpush1.bf16.msra.mxu0 %v4191_v16  ;;  %3443 = vmatpush3.bf16.msra.mxu1 %v4205_v26 }
 0x48e   :  { %3420 = vmatprep.subr.bf16.mxu0 %v4194_v18  ;;  %3444 = vmatprep.subr.bf16.mxu1 %v3946_v0 }
 0x491   :  { %3422 = vmatpush1.bf16.msra.mxu0 %v4201_v25  ;;  %3446 = vmatpush3.bf16.msra.mxu1 %v4210_v31 }
 0x492   :  { %3448 = vmatprep.subr.bf16.mxu0 %v4128_v33  ;;  %3479 = vmatprep.subr.bf16.mxu1 %v3946_v0 }
 0x547   :  { %v1253_v46 = vpop.f32.mrb[10].mxu0  ;;  %v1324_v41 = vpop.f32.mrb[8].mxu1 }
 0x548   :  { %v1254_v55 = vadd.f32 %v1253_v46, %v4310_v61  ;;  %v1255_v2 = vpop.f32.mrb[11].mxu0  ;;  %v2927_v58 = vpop.f32.mrb[9].mxu1  ;;  %v1325_v50 = vadd.f32 %v1324_v41, %v4321_v34  ;;  %v1361_v46 = vld [vmem:[#allocation2 + $0x12] sm:$0x3f] }
 0x549   :  { %v1256_v49 = vadd.f32 %v1255_v2, %v4314_v42 }
 0x54b   :  { %v1330_v51 = vcombine.low %v1254_v55, %v1256_v49 }
 0x54d   :  { %v1337_v57 = vrot.slane %v1330_v51, %v4264_v53 }
 0x54f   :  { %v1339_v56 = vadd.f32 %v1337_v57, %v1186_v40  ;;  %v1523_v40 = vrot.slane %v1361_v46, 4 }
 0x551   :  { %v2499_v4 = vmul.f32 -1.442695, %v1339_v56 }
 0x553   :  { %3712 = vpow2.f32 %v2499_v4 }
 0x55d   :  { %v3713_v6 = vpop.eup %3712 }
 0x55e   :  { %v1343_v9 = vadd.f32 1.0, %v3713_v6 }
 0x560   :  { %3714 = vrcp.f32 %v1343_v9 }
 0x56a   :  { %v3715_v5 = vpop.eup %3714 }
 0x56b   :  { %v1346_v10 = vmul.f32 %v3715_v5, %v1325_v50  ;;  %v1353_v14 = vrot.slane %v3715_v5, 2 }
 0x56d   :  { %v1350_v13 = vadd.f32 %v1348_v11, %v1346_v10  ;;  %v1355_v63 = vsub.f32 1.0, %v1353_v14  ;;  %v1357_v20 = vmul.f32 %v1353_v14, %v4370_v37 }
 0x56f   :  { %3716 = vtanh.f32 %v1350_v13 }
 0x579   :  { %v3717_v44 = vpop.eup %3716 }
 0x57a   :  { %v1356_v15 = vmul.f32 %v3717_v44, %v1355_v63 }
 0x57c   :  { %v4415_v21 = vadd.f32 %v1357_v20, %v1356_v15 }
 0x57e   :  { %1360 = vst [vmem:[#allocation3 + $0x4] sm:$0x3] %v4415_v21  ;;  %1427 = vmatmul.mubr.f32.vlgmr.msra.gmra.mrb[12].mxu0 %v4415_v21  ;;  %2961 = vmatmul.mubr.f32.vlgmr.msra.gmra.mrb[10].mxu1 %v4415_v21 }
 0x57f   :  { %3450 = vmatpush1.bf16.msra.mxu0 %v4132_v17  ;;  %3481 = vmatpush3.bf16.msra.mxu1 %v4145_v35 }
 0x580   :  { %3452 = vmatprep.subr.bf16.mxu0 %v4135_v19  ;;  %3482 = vmatprep.subr.bf16.mxu1 %v3946_v0 }
 0x581   :  { %1601 = vmatprep.mubr.f32.mxu0 %v3948_v1  ;;  %2995 = vmatprep.mubr.msk.f32.mxu1 %vm3947_vm0, %v3948_v1 }
 0x583   :  { %3454 = vmatpush1.bf16.msra.mxu0 %v4139_v29  ;;  %3484 = vmatpush3.bf16.msra.mxu1 %v4155_v43 }
 0x584   :  { %3456 = vmatprep.subr.bf16.mxu0 %v4143_v30  ;;  %3485 = vmatprep.subr.bf16.mxu1 %v3946_v0 }
 0x585   :  { %v2511_v23 = vld.sshfl [vmem:[#allocation3 + $0x4] sm:$0x11 pattern:$0x75316420] }
 0x586   :  { %v2307_v24 = vcombine.high %v2511_v23, %v2511_v23  ;;  %2512 = vst.sshfl [vmem:[#allocation15 + $0x2] sm:$0x1 pattern:$0x73625140] %v2511_v23 }
 0x587   :  { %3458 = vmatpush1.bf16.msra.mxu0 %v4148_v39  ;;  %3487 = vmatpush3.bf16.msra.mxu1 %v4167_v54 }
 0x588   :  { %2513 = vst.sshfl [vmem:[#allocation15 + $0xa] sm:$0x1 pattern:$0x73625140] %v2307_v24  ;;  %3460 = vmatprep.subr.bf16.mxu0 %v4152_v52  ;;  %3488 = vmatprep.subr.bf16.mxu1 %v3946_v0 }
 0x58b   :  { %3462 = vmatpush1.bf16.msra.mxu0 %v4161_v47  ;;  %3490 = vmatpush3.bf16.msra.mxu1 %v4177_v3 }
 0x58c   :  { %3464 = vmatprep.subr.bf16.mxu0 %v4164_v48  ;;  %3491 = vmatprep.subr.bf16.mxu1 %v3946_v0 }
 0x58f   :  { %3466 = vmatpush1.bf16.msra.mxu0 %v4171_v59  ;;  %3493 = vmatpush3.bf16.msra.mxu1 %v4187_v12 }
 0x590   :  { %3468 = vmatprep.subr.bf16.mxu0 %v4174_v60  ;;  %3494 = vmatprep.subr.bf16.mxu1 %v3946_v0 }
 0x593   :  { %3470 = vmatpush1.bf16.msra.mxu0 %v4181_v7  ;;  %3496 = vmatpush3.bf16.msra.mxu1 %v4197_v22 }
 0x594   :  { %3472 = vmatprep.subr.bf16.mxu0 %v4184_v8  ;;  %3497 = vmatprep.subr.bf16.mxu1 %v3946_v0 }
 0x597   :  { %3474 = vmatpush1.bf16.msra.mxu0 %v4191_v16  ;;  %3499 = vmatpush3.bf16.msra.mxu1 %v4205_v26 }
 0x598   :  { %3476 = vmatprep.subr.bf16.mxu0 %v4194_v18  ;;  %3500 = vmatprep.subr.bf16.mxu1 %v3946_v0 }
 0x59b   :  { %3478 = vmatpush1.bf16.msra.mxu0 %v4201_v25  ;;  %3502 = vmatpush3.bf16.msra.mxu1 %v4210_v31 }
 0x59c   :  { %3504 = vmatprep.subr.bf16.mxu0 %v4128_v33  ;;  %3535 = vmatprep.subr.bf16.mxu1 %v3946_v0 }
 0x651   :  { %v1428_v27 = vpop.f32.mrb[12].mxu0  ;;  %v1499_v62 = vpop.f32.mrb[10].mxu1 }
 0x652   :  { %v1429_v28 = vadd.f32 %v1428_v27, %v4310_v61  ;;  %v1430_v32 = vpop.f32.mrb[13].mxu0  ;;  %v2962_v36 = vpop.f32.mrb[11].mxu1  ;;  %v1500_v49 = vadd.f32 %v1499_v62, %v4321_v34  ;;  %v1536_v27 = vld [vmem:[#allocation2 + $0x18] sm:$0x3f] }
 0x653   :  { %v1431_v37 = vadd.f32 %v1430_v32, %v4314_v42 }
 0x655   :  { %v1505_v45 = vcombine.low %v1429_v28, %v1431_v37 }
 0x657   :  { %v1512_v38 = vrot.slane %v1505_v45, %v4264_v53 }
 0x659   :  { %v1514_v41 = vadd.f32 %v1512_v38, %v1361_v46  ;;  %v1698_v46 = vrot.slane %v1536_v27, 4 }
 0x65b   :  { %v2500_v55 = vmul.f32 -1.442695, %v1514_v41 }
 0x65d   :  { %3718 = vpow2.f32 %v2500_v55 }
 0x667   :  { %v3719_v2 = vpop.eup %3718 }
 0x668   :  { %v1518_v58 = vadd.f32 1.0, %v3719_v2 }
 0x66a   :  { %3720 = vrcp.f32 %v1518_v58 }
 0x674   :  { %v3721_v51 = vpop.eup %3720 }
 0x675   :  { %v1521_v57 = vmul.f32 %v3721_v51, %v1500_v49  ;;  %v1528_v4 = vrot.slane %v3721_v51, 2 }
 0x677   :  { %v1525_v56 = vadd.f32 %v1523_v40, %v1521_v57  ;;  %v1530_v6 = vsub.f32 1.0, %v1528_v4  ;;  %v1532_v5 = vmul.f32 %v1528_v4, %v4415_v21 }
 0x679   :  { %3722 = vtanh.f32 %v1525_v56 }
 0x683   :  { %v3723_v9 = vpop.eup %3722 }
 0x684   :  { %v1531_v50 = vmul.f32 %v3723_v9, %v1530_v6 }
 0x686   :  { %v4460_v10 = vadd.f32 %v1532_v5, %v1531_v50 }
 0x688   :  { %1535 = vst [vmem:[#allocation3 + $0x6] sm:$0x3] %v4460_v10  ;;  %1602 = vmatmul.mubr.f32.vlgmr.msra.gmra.mrb[14].mxu0 %v4460_v10  ;;  %2996 = vmatmul.mubr.f32.vlgmr.msra.gmra.mrb[12].mxu1 %v4460_v10 }
 0x689   :  { %3506 = vmatpush1.bf16.msra.mxu0 %v4132_v17  ;;  %3537 = vmatpush3.bf16.msra.mxu1 %v4145_v35 }
 0x68a   :  { %3508 = vmatprep.subr.bf16.mxu0 %v4135_v19  ;;  %3538 = vmatprep.subr.bf16.mxu1 %v3946_v0 }
 0x68b   :  { %1776 = vmatprep.mubr.f32.mxu0 %v3948_v1  ;;  %3030 = vmatprep.mubr.msk.f32.mxu1 %vm3947_vm0, %v3948_v1 }
 0x68d   :  { %3510 = vmatpush1.bf16.msra.mxu0 %v4139_v29  ;;  %3540 = vmatpush3.bf16.msra.mxu1 %v4155_v43 }
 0x68e   :  { %3512 = vmatprep.subr.bf16.mxu0 %v4143_v30  ;;  %3541 = vmatprep.subr.bf16.mxu1 %v3946_v0 }
 0x68f   :  { %v2514_v11 = vld.sshfl [vmem:[#allocation3 + $0x6] sm:$0x11 pattern:$0x75316420] }
 0x690   :  { %v2334_v13 = vcombine.high %v2514_v11, %v2514_v11  ;;  %2515 = vst.sshfl [vmem:[#allocation15 + $0x3] sm:$0x1 pattern:$0x73625140] %v2514_v11 }
 0x691   :  { %3514 = vmatpush1.bf16.msra.mxu0 %v4148_v39  ;;  %3543 = vmatpush3.bf16.msra.mxu1 %v4167_v54 }
 0x692   :  { %2516 = vst.sshfl [vmem:[#allocation15 + $0xb] sm:$0x1 pattern:$0x73625140] %v2334_v13  ;;  %3516 = vmatprep.subr.bf16.mxu0 %v4152_v52  ;;  %3544 = vmatprep.subr.bf16.mxu1 %v3946_v0 }
 0x695   :  { %3518 = vmatpush1.bf16.msra.mxu0 %v4161_v47  ;;  %3546 = vmatpush3.bf16.msra.mxu1 %v4177_v3 }
 0x696   :  { %3520 = vmatprep.subr.bf16.mxu0 %v4164_v48  ;;  %3547 = vmatprep.subr.bf16.mxu1 %v3946_v0 }
 0x699   :  { %3522 = vmatpush1.bf16.msra.mxu0 %v4171_v59  ;;  %3549 = vmatpush3.bf16.msra.mxu1 %v4187_v12 }
 0x69a   :  { %3524 = vmatprep.subr.bf16.mxu0 %v4174_v60  ;;  %3550 = vmatprep.subr.bf16.mxu1 %v3946_v0 }
 0x69d   :  { %3526 = vmatpush1.bf16.msra.mxu0 %v4181_v7  ;;  %3552 = vmatpush3.bf16.msra.mxu1 %v4197_v22 }
 0x69e   :  { %3528 = vmatprep.subr.bf16.mxu0 %v4184_v8  ;;  %3553 = vmatprep.subr.bf16.mxu1 %v3946_v0 }
 0x6a1   :  { %3530 = vmatpush1.bf16.msra.mxu0 %v4191_v16  ;;  %3555 = vmatpush3.bf16.msra.mxu1 %v4205_v26 }
 0x6a2   :  { %3532 = vmatprep.subr.bf16.mxu0 %v4194_v18  ;;  %3556 = vmatprep.subr.bf16.mxu1 %v3946_v0 }
 0x6a5   :  { %3534 = vmatpush1.bf16.msra.mxu0 %v4201_v25  ;;  %3558 = vmatpush3.bf16.msra.mxu1 %v4210_v31 }
 0x6a6   :  { %3560 = vmatprep.subr.bf16.mxu0 %v4128_v33  ;;  %3591 = vmatprep.subr.bf16.mxu1 %v3946_v0 }
 0x75b   :  { %v1603_v14 = vpop.f32.mrb[14].mxu0  ;;  %v1674_v63 = vpop.f32.mrb[12].mxu1 }
 0x75c   :  { %v1604_v44 = vadd.f32 %v1603_v14, %v4310_v61  ;;  %v1605_v15 = vpop.f32.mrb[15].mxu0  ;;  %v2997_v20 = vpop.f32.mrb[13].mxu1  ;;  %v1675_v37 = vadd.f32 %v1674_v63, %v4321_v34  ;;  %v1711_v14 = vld [vmem:[#allocation2 + $0x1e] sm:$0x3f] }
 0x75d   :  { %v1606_v21 = vadd.f32 %v1605_v15, %v4314_v42 }
 0x75f   :  { %v1680_v23 = vcombine.low %v1604_v44, %v1606_v21 }
 0x761   :  { %v1687_v24 = vrot.slane %v1680_v23, %v4264_v53 }
 0x763   :  { %v1689_v62 = vadd.f32 %v1687_v24, %v1536_v27  ;;  %v1873_v24 = vrot.slane %v1711_v14, 4 }
 0x765   :  { %v2501_v28 = vmul.f32 -1.442695, %v1689_v62 }
 0x767   :  { %3724 = vpow2.f32 %v2501_v28 }
 0x771   :  { %v3725_v32 = vpop.eup %3724 }
 0x772   :  { %v1693_v36 = vadd.f32 1.0, %v3725_v32 }
 0x774   :  { %3726 = vrcp.f32 %v1693_v36 }
 0x77e   :  { %v3727_v45 = vpop.eup %3726 }
 0x77f   :  { %v1696_v38 = vmul.f32 %v3727_v45, %v1675_v37  ;;  %v1703_v55 = vrot.slane %v3727_v45, 2 }
 0x781   :  { %v1700_v41 = vadd.f32 %v1698_v46, %v1696_v38  ;;  %v1705_v2 = vsub.f32 1.0, %v1703_v55  ;;  %v1707_v51 = vmul.f32 %v1703_v55, %v4460_v10 }
 0x783   :  { %3728 = vtanh.f32 %v1700_v41 }
 0x78d   :  { %v3729_v58 = vpop.eup %3728 }
 0x78e   :  { %v1706_v49 = vmul.f32 %v3729_v58, %v1705_v2 }
 0x790   :  { %v4505_v57 = vadd.f32 %v1707_v51, %v1706_v49 }
 0x792   :  { %1710 = vst [vmem:[#allocation3 + $0x8] sm:$0x3] %v4505_v57  ;;  %1777 = vmatmul.mubr.f32.vlgmr.msra.gmra.mrb[16].mxu0 %v4505_v57  ;;  %3031 = vmatmul.mubr.f32.vlgmr.msra.gmra.mrb[14].mxu1 %v4505_v57 }
 0x793   :  { %3562 = vmatpush1.bf16.msra.mxu0 %v4132_v17  ;;  %3593 = vmatpush3.bf16.msra.mxu1 %v4145_v35 }
 0x794   :  { %3564 = vmatprep.subr.bf16.mxu0 %v4135_v19  ;;  %3594 = vmatprep.subr.bf16.mxu1 %v3946_v0 }
 0x795   :  { %1951 = vmatprep.mubr.f32.mxu0 %v3948_v1  ;;  %3065 = vmatprep.mubr.msk.f32.mxu1 %vm3947_vm0, %v3948_v1 }
 0x797   :  { %3566 = vmatpush1.bf16.msra.mxu0 %v4139_v29  ;;  %3596 = vmatpush3.bf16.msra.mxu1 %v4155_v43 }
 0x798   :  { %3568 = vmatprep.subr.bf16.mxu0 %v4143_v30  ;;  %3597 = vmatprep.subr.bf16.mxu1 %v3946_v0 }
 0x799   :  { %v2517_v40 = vld.sshfl [vmem:[#allocation3 + $0x8] sm:$0x11 pattern:$0x75316420] }
 0x79a   :  { %v2361_v56 = vcombine.high %v2517_v40, %v2517_v40  ;;  %2518 = vst.sshfl [vmem:[#allocation15 + $0x4] sm:$0x1 pattern:$0x73625140] %v2517_v40 }
 0x79b   :  { %3570 = vmatpush1.bf16.msra.mxu0 %v4148_v39  ;;  %3599 = vmatpush3.bf16.msra.mxu1 %v4167_v54 }
 0x79c   :  { %2519 = vst.sshfl [vmem:[#allocation15 + $0xc] sm:$0x1 pattern:$0x73625140] %v2361_v56  ;;  %3572 = vmatprep.subr.bf16.mxu0 %v4152_v52  ;;  %3600 = vmatprep.subr.bf16.mxu1 %v3946_v0 }
 0x79f   :  { %3574 = vmatpush1.bf16.msra.mxu0 %v4161_v47  ;;  %3602 = vmatpush3.bf16.msra.mxu1 %v4177_v3 }
 0x7a0   :  { %3576 = vmatprep.subr.bf16.mxu0 %v4164_v48  ;;  %3603 = vmatprep.subr.bf16.mxu1 %v3946_v0 }
 0x7a3   :  { %3578 = vmatpush1.bf16.msra.mxu0 %v4171_v59  ;;  %3605 = vmatpush3.bf16.msra.mxu1 %v4187_v12 }
 0x7a4   :  { %3580 = vmatprep.subr.bf16.mxu0 %v4174_v60  ;;  %3606 = vmatprep.subr.bf16.mxu1 %v3946_v0 }
 0x7a7   :  { %3582 = vmatpush1.bf16.msra.mxu0 %v4181_v7  ;;  %3608 = vmatpush3.bf16.msra.mxu1 %v4197_v22 }
 0x7a8   :  { %3584 = vmatprep.subr.bf16.mxu0 %v4184_v8  ;;  %3609 = vmatprep.subr.bf16.mxu1 %v3946_v0 }
 0x7ab   :  { %3586 = vmatpush1.bf16.msra.mxu0 %v4191_v16  ;;  %3611 = vmatpush3.bf16.msra.mxu1 %v4205_v26 }
 0x7ac   :  { %3588 = vmatprep.subr.bf16.mxu0 %v4194_v18  ;;  %3612 = vmatprep.subr.bf16.mxu1 %v3946_v0 }
 0x7af   :  { %3590 = vmatpush1.bf16.msra.mxu0 %v4201_v25  ;;  %3614 = vmatpush3.bf16.msra.mxu1 %v4210_v31 }
 0x7b0   :  { %3616 = vmatprep.subr.bf16.mxu0 %v4128_v33  ;;  %3647 = vmatprep.subr.bf16.mxu1 %v3946_v0 }
 0x865   :  { %v1778_v4 = vpop.f32.mrb[16].mxu0  ;;  %v1849_v6 = vpop.f32.mrb[14].mxu1 }
 0x866   :  { %v1779_v9 = vadd.f32 %v1778_v4, %v4310_v61  ;;  %v1780_v50 = vpop.f32.mrb[17].mxu0  ;;  %v3032_v5 = vpop.f32.mrb[15].mxu1  ;;  %v1850_v33 = vadd.f32 %v1849_v6, %v4321_v34  ;;  %v2061_v4 = vld [vmem:[#allocation2 + $0x2a] sm:$0x3f] }
 0x867   :  { %v1781_v10 = vadd.f32 %v1780_v50, %v4314_v42 }
 0x869   :  { %v1855_v11 = vcombine.low %v1779_v9, %v1781_v10 }
 0x86b   :  { %v1862_v13 = vrot.slane %v1855_v11, %v4264_v53 }
 0x86d   :  { %v1864_v63 = vadd.f32 %v1862_v13, %v1711_v14  ;;  %v2223_v14 = vrot.slane %v2061_v4, 4 }
 0x86f   :  { %v2502_v44 = vmul.f32 -1.442695, %v1864_v63 }
 0x871   :  { %3730 = vpow2.f32 %v2502_v44 }
 0x87b   :  { %v3731_v15 = vpop.eup %3730 }
 0x87c   :  { %v1868_v20 = vadd.f32 1.0, %v3731_v15 }
 0x87e   :  { %3732 = vrcp.f32 %v1868_v20 }
 0x888   :  { %v3733_v21 = vpop.eup %3732 }
 0x889   :  { %v1871_v23 = vmul.f32 %v3733_v21, %v1850_v33  ;;  %v1878_v62 = vrot.slane %v3733_v21, 2 }
 0x88b   :  { %v1875_v27 = vadd.f32 %v1873_v24, %v1871_v23  ;;  %v1880_v28 = vsub.f32 1.0, %v1878_v62  ;;  %v1882_v37 = vmul.f32 %v1878_v62, %v4505_v57 }
 0x88d   :  { %3734 = vtanh.f32 %v1875_v27 }
 0x897   :  { %v3735_v32 = vpop.eup %3734 }
 0x898   :  { %v1881_v36 = vmul.f32 %v3735_v32, %v1880_v28 }
 0x89a   :  { %v4550_v45 = vadd.f32 %v1882_v37, %v1881_v36 }
 0x89c   :  { %1885 = vst [vmem:[#allocation3 + $0xa] sm:$0x3] %v4550_v45  ;;  %1952 = vmatmul.mubr.f32.vlgmr.msra.gmra.mrb[18].mxu0 %v4550_v45  ;;  %3066 = vmatmul.mubr.f32.vlgmr.msra.gmra.mrb[16].mxu1 %v4550_v45 }
 0x89d   :  { %3618 = vmatpush1.bf16.msra.mxu0 %v4132_v17  ;;  %3649 = vmatpush3.bf16.msra.mxu1 %v4145_v35 }
 0x89e   :  { %3620 = vmatprep.subr.bf16.mxu0 %v4135_v19  ;;  %3650 = vmatprep.subr.bf16.mxu1 %v3946_v0 }
 0x89f   :  { %2126 = vmatprep.mubr.f32.mxu0 %v3948_v1  ;;  %3100 = vmatprep.mubr.msk.f32.mxu1 %vm3947_vm0, %v3948_v1 }
 0x8a1   :  { %3622 = vmatpush1.bf16.msra.mxu0 %v4139_v29  ;;  %3652 = vmatpush3.bf16.msra.mxu1 %v4155_v43 }
 0x8a2   :  { %3624 = vmatprep.subr.bf16.mxu0 %v4143_v30  ;;  %3653 = vmatprep.subr.bf16.mxu1 %v3946_v0 }
 0x8a3   :  { %v2520_v17 = vld.sshfl [vmem:[#allocation3 + $0xa] sm:$0x11 pattern:$0x75316420] }
 0x8a4   :  { %v2388_v38 = vcombine.high %v2520_v17, %v2520_v17  ;;  %2521 = vst.sshfl [vmem:[#allocation15 + $0x5] sm:$0x1 pattern:$0x73625140] %v2520_v17 }
 0x8a5   :  { %3626 = vmatpush1.bf16.msra.mxu0 %v4148_v39  ;;  %3655 = vmatpush3.bf16.msra.mxu1 %v4167_v54 }
 0x8a6   :  { %2522 = vst.sshfl [vmem:[#allocation15 + $0xd] sm:$0x1 pattern:$0x73625140] %v2388_v38  ;;  %3628 = vmatprep.subr.bf16.mxu0 %v4152_v52  ;;  %3656 = vmatprep.subr.bf16.mxu1 %v3946_v0 }
 0x8a9   :  { %3630 = vmatpush1.bf16.msra.mxu0 %v4161_v47  ;;  %3658 = vmatpush3.bf16.msra.mxu1 %v4177_v3  ;;  %v1886_v47 = vld [vmem:[#allocation2 + $0x24] sm:$0x3f] }
 0x8aa   :  { %3632 = vmatprep.subr.bf16.mxu0 %v4164_v48  ;;  %3659 = vmatprep.subr.bf16.mxu1 %v3946_v0 }
 0x8ad   :  { %3634 = vmatpush1.bf16.msra.mxu0 %v4171_v59  ;;  %3661 = vmatpush3.bf16.msra.mxu1 %v4187_v12 }
 0x8ae   :  { %3636 = vmatprep.subr.bf16.mxu0 %v4174_v60  ;;  %3662 = vmatprep.subr.bf16.mxu1 %v3946_v0 }
 0x8b1   :  { %3638 = vmatpush1.bf16.msra.mxu0 %v4181_v7  ;;  %3664 = vmatpush3.bf16.msra.mxu1 %v4197_v22 }
 0x8b2   :  { %3640 = vmatprep.subr.bf16.mxu0 %v4184_v8  ;;  %3665 = vmatprep.subr.bf16.mxu1 %v3946_v0  ;;  %v2048_v8 = vrot.slane %v1886_v47, 4 }
 0x8b5   :  { %3642 = vmatpush1.bf16.msra.mxu0 %v4191_v16  ;;  %3667 = vmatpush3.bf16.msra.mxu1 %v4205_v26 }
 0x8b6   :  { %3644 = vmatprep.subr.bf16.mxu0 %v4194_v18  ;;  %3668 = vmatprep.subr.bf16.mxu1 %v3946_v0 }
 0x8b9   :  { %3646 = vmatpush1.bf16.msra.mxu0 %v4201_v25  ;;  %3670 = vmatpush3.bf16.msra.mxu1 %v4210_v31 }
 0x96f   :  { %v1953_v1 = vpop.f32.mrb[18].mxu0  ;;  %v2024_v19 = vpop.f32.mrb[16].mxu1 }
 0x970   :  { %v1954_v29 = vadd.f32 %v1953_v1, %v4310_v61  ;;  %v1955_v30 = vpop.f32.mrb[19].mxu0  ;;  %v3067_v35 = vpop.f32.mrb[17].mxu1  ;;  %v2025_v60 = vadd.f32 %v2024_v19, %v4321_v34 }
 0x971   :  { %v1956_v39 = vadd.f32 %v1955_v30, %v4314_v42 }
 0x973   :  { %v2030_v52 = vcombine.low %v1954_v29, %v1956_v39 }
 0x975   :  { %v2037_v43 = vrot.slane %v2030_v52, %v4264_v53 }
 0x977   :  { %v2039_v48 = vadd.f32 %v2037_v43, %v1886_v47 }
 0x979   :  { %v2503_v54 = vmul.f32 -1.442695, %v2039_v48 }
 0x97b   :  { %3736 = vpow2.f32 %v2503_v54 }
 0x985   :  { %v3737_v0 = vpop.eup %3736 }
 0x986   :  { %v2043_v59 = vadd.f32 1.0, %v3737_v0 }
 0x988   :  { %3738 = vrcp.f32 %v2043_v59 }
 0x992   :  { %v3739_v3 = vpop.eup %3738 }
 0x993   :  { %v2046_v7 = vmul.f32 %v3739_v3, %v2025_v60  ;;  %v2053_v16 = vrot.slane %v3739_v3, 2 }
 0x995   :  { %v2050_v12 = vadd.f32 %v2048_v8, %v2046_v7  ;;  %v2055_v18 = vsub.f32 1.0, %v2053_v16  ;;  %v2057_v26 = vmul.f32 %v2053_v16, %v4550_v45 }
 0x997   :  { %3740 = vtanh.f32 %v2050_v12 }
 0x9a1   :  { %v3741_v22 = vpop.eup %3740 }
 0x9a2   :  { %v2056_v25 = vmul.f32 %v3741_v22, %v2055_v18 }
 0x9a4   :  { %v2058_v31 = vadd.f32 %v2057_v26, %v2056_v25 }
 0x9a6   :  { %2060 = vst [vmem:[#allocation3 + $0xc] sm:$0x3] %v2058_v31  ;;  %2127 = vmatmul.mubr.f32.vlgmr.msra.gmra.mrb[20].mxu0 %v2058_v31  ;;  %3101 = vmatmul.mubr.f32.vlgmr.msra.gmra.mrb[18].mxu1 %v2058_v31 }
 0x9ad   :  { %v2523_v46 = vld.sshfl [vmem:[#allocation3 + $0xc] sm:$0x11 pattern:$0x75316420] }
 0x9ae   :  { %v2415_v41 = vcombine.high %v2523_v46, %v2523_v46  ;;  %2524 = vst.sshfl [vmem:[#allocation15 + $0x6] sm:$0x1 pattern:$0x73625140] %v2523_v46 }
 0x9b0   :  { %2525 = vst.sshfl [vmem:[#allocation15 + $0xe] sm:$0x1 pattern:$0x73625140] %v2415_v41 }
 0xa79   :  { %v2128_v55 = vpop.f32.mrb[20].mxu0  ;;  %v2199_v2 = vpop.f32.mrb[18].mxu1 }
 0xa7a   :  { %v2129_v58 = vadd.f32 %v2128_v55, %v4310_v61  ;;  %v2130_v49 = vpop.f32.mrb[21].mxu0  ;;  %v3102_v51 = vpop.f32.mrb[19].mxu1  ;;  %v2200_v10 = vadd.f32 %v2199_v2, %v4321_v34 }
 0xa7b   :  { %v2131_v57 = vadd.f32 %v2130_v49, %v4314_v42 }
 0xa7d   :  { %v2205_v40 = vcombine.low %v2129_v58, %v2131_v57 }
 0xa7f   :  { %v2212_v56 = vrot.slane %v2205_v40, %v4264_v53 }
 0xa81   :  { %v2214_v6 = vadd.f32 %v2212_v56, %v2061_v4 }
 0xa83   :  { %v2504_v9 = vmul.f32 -1.442695, %v2214_v6 }
 0xa85   :  { %3742 = vpow2.f32 %v2504_v9 }
 0xa8f   :  { %v3743_v50 = vpop.eup %3742 }
 0xa90   :  { %v2218_v5 = vadd.f32 1.0, %v3743_v50 }
 0xa92   :  { %3744 = vrcp.f32 %v2218_v5 }
 0xa9c   :  { %v3745_v11 = vpop.eup %3744 }
 0xa9d   :  { %v2221_v13 = vmul.f32 %v3745_v11, %v2200_v10  ;;  %v2228_v63 = vrot.slane %v3745_v11, 2 }
 0xa9f   :  { %v2225_v61 = vadd.f32 %v2223_v14, %v2221_v13  ;;  %v2230_v44 = vsub.f32 1.0, %v2228_v63  ;;  %v2232_v15 = vmul.f32 %v2228_v63, %v2058_v31 }
 0xaa1   :  { %3746 = vtanh.f32 %v2225_v61 }
 0xaab   :  { %v3747_v42 = vpop.eup %3746 }
 0xaac   :  { %v2231_v53 = vmul.f32 %v3747_v42, %v2230_v44 }
 0xaae   :  { %v2233_v20 = vadd.f32 %v2232_v15, %v2231_v53 }
 0xab0   :  { %2235 = vst [vmem:[#allocation3 + $0xe] sm:$0x3] %v2233_v20  ;;  %2236 = vst [vmem:[#allocation16] sm:$0x3] %v2233_v20 }
 0xab1   :  { %3891 = shalt.err (!%p3888_p10)
}
 0xab2   :  { %s3892_s21 = scalar_lea.hbm %s4635_s11, 32 }
 0xab3   :  { %p3893_p11 = scmp.ne.s32.totalorder %s4635_s11, %s3892_s21  ;;  %p3896_p12 = scmp.lt.u32.totalorder %s3892_s21, %s4635_s11 }
 0xab5   :  { %p3898_p13 = pnand %p3896_p12, %p3893_p11 }
 0xab7   :  { %3901 = shalt.err (!%p3898_p13)
}
 0xab8   :  { %2482 = dma.vmem_to_hbm [thread:$0]  %s2480_s16, 32, %s4635_s11, [#allocation17]   ;;  %v2526_v34 = vld.sshfl [vmem:[#allocation3 + $0xe] sm:$0x11 pattern:$0x75316420] }
 0xab9   :  { %s3952_s0 = smov [#allocation15]   ;;  %v2442_v33 = vcombine.high %v2526_v34, %v2526_v34  ;;  %2527 = vst.sshfl [vmem:[#allocation15 + $0x7] sm:$0x1 pattern:$0x73625140] %v2526_v34 }
 0xaba   :  { %s2466_s13 = sshll.u32 %s3952_s0, 4  ;;  %s2467_s13 = int_to_ptr.vmem [resolvable:$true] %s2466_s13 }
 0xabb   :  { %2528 = vst.sshfl [vmem:[#allocation15 + $0xf] sm:$0x1 pattern:$0x73625140] %v2442_v33  ;;  %s3902_s28 = scalar_lea.vmem %s2467_s13, 256  ;;  %p3907_p1 = scmp.lt.s32.totalorder %s2467_s13, %s2467_s13 }
 0xabc   :  { %p3903_p0 = scmp.ne.s32.totalorder %s2467_s13, %s3902_s28  ;;  %p3908_p2 = scmp.lt.s32.totalorder %s3902_s28, %s3902_s28 }
 0xabe   :  { %p3909_p3 = por %p3908_p2, %p3907_p1 }
 0xac0   :  { %p3910_p4 = pnand %p3909_p3, %p3903_p0 }
 0xac2   :  { %3913 = shalt.err (!%p3910_p4)
}
 0xac3   :  { %s3914_s6 = scalar_lea.hbm %s4634_s10, 256 }
 0xac4   :  { %p3915_p5 = scmp.ne.s32.totalorder %s4634_s10, %s3914_s6  ;;  %p3918_p6 = scmp.lt.u32.totalorder %s3914_s6, %s4634_s10 }
 0xac6   :  { %p3920_p7 = pnand %p3918_p6, %p3915_p5 }
 0xac8   :  { %3923 = shalt.err (!%p3920_p7)
}
 0xac9   :  { %2472 = dma.vmem_to_hbm [thread:$0]  %s2467_s13, 256, %s4634_s10, [#allocation6], %s3939_s18, %s3939_s18, %s3940_s22  }
 0xaca   :  { %3932 = dma.done.wait [#allocation6], 256  }
 0xacb   :  { %3933 = vsyncadd [#allocation6], 4294967040 }
 0xacc   :  { %3934 = dma.done.wait [#allocation17], 32  }
 0xacd   :  { %3935 = vsyncadd [#allocation17], 4294967264 }
 0xace   :  { %2489 = vsyncpa [#allocation5], 1 }
 0xacf   :  { %2490 = vsyncpa [#allocation8], 1 }
 0xad0   :  { %2491 = vsyncpa [#allocation11], 1 }
 0xad1   :  { %2492 = vsyncpa [#allocation14], 1 }
 0xad2   :  { %2493 = vsyncpa [#allocation6], 1 }
 0xad3   :  { %2494 = vsyncpa [#allocation17], 1 }

</bundles_post_ra>
